<compile_context>
chip_gen: v6e
topology: v6e:2x2x1
jax: 0.10.0
libtpu: 0.0.40
codegen_flags: <defaults>
</compile_context>

<pallas_src>
import jax
import jax.numpy as jnp
from jax.experimental import pallas as pl
from jax.experimental.pallas import tpu as pltpu

LANE = 128  # TPU vreg lane width


def _round_up(x, m):
    return (x + m - 1) // m * m


def _lstm_classifier_kernel(
    x_ref,      # (T*B, I)   bf16  time-major flattened input (row r = t*B + b)
    w_ih_ref,   # (I, 4*Hp)  bf16  input->gates weights, gate-padded
    w_hh_ref,   # (Hp, 4*Hp) bf16  hidden->gates weights, gate-padded
    b_ref,      # (1, 4*Hp)  f32   b_ih + b_hh, gate-padded
    wd_ref,     # (Hp, Op)   f32   dense weight^T, padded
    bd_ref,     # (1, Op)    f32   dense bias, padded
    out_ref,    # (B, Op)    f32   sigmoid(dense(h_T)), lane-padded
):
    TB, _ = x_ref.shape
    B = out_ref.shape[0]
    T = TB // B
    G = w_hh_ref.shape[1]
    Hp = G // 4

    # ---- Phase 1: input projection for ALL timesteps in one MXU matmul ----
    xp = jnp.dot(x_ref[...], w_ih_ref[...],
                 preferred_element_type=jnp.float32) + b_ref[...]   # (T*B, G)

    # ---- Phase 2: sequential recurrence (unrolled; T is small & static) ----
    # For large T, switch this to lax.fori_loop over a VMEM-resident xp.
    h = jnp.zeros((B, Hp), jnp.float32)
    c = jnp.zeros((B, Hp), jnp.float32)
    for t in range(T):
        gates = xp[t * B:(t + 1) * B, :] + jnp.dot(
            h.astype(w_hh_ref.dtype), w_hh_ref[...],
            preferred_element_type=jnp.float32)                     # (B, G)
        # Lane-aligned (128-multiple) gate slices -> free views.
        i_g = jax.nn.sigmoid(gates[:, 0 * Hp:1 * Hp])
        f_g = jax.nn.sigmoid(gates[:, 1 * Hp:2 * Hp])
        g_g = jnp.tanh(gates[:, 2 * Hp:3 * Hp])
        o_g = jax.nn.sigmoid(gates[:, 3 * Hp:4 * Hp])
        c = f_g * c + i_g * g_g
        h = o_g * jnp.tanh(c)

    # ---- Phase 3: dense head on final hidden state + sigmoid ----
    logits = jnp.dot(h, wd_ref[...],
                     preferred_element_type=jnp.float32) + bd_ref[...]
    out_ref[...] = jax.nn.sigmoid(logits)


def lstm_classifier_forward(x, params):
    """x: (B, T, I) float32.  Returns (B, target_dim) float32."""
    B, T, I = x.shape
    w_ih = params["w_ih_t_pad"]        # (I, 4*Hp)  bf16
    w_hh = params["w_hh_t_pad"]        # (Hp, 4*Hp) bf16
    b = params["b_pad"]                # (1, 4*Hp)  f32
    wd = params["w_dense_t_pad"]       # (Hp, Op)   f32
    bd = params["b_dense_pad"]         # (1, Op)    f32
    target_dim = params["target_dim"]
    Hp = w_hh.shape[0]
    G = 4 * Hp
    Op = wd.shape[1]

    # Time-major flatten so in-kernel per-step slices are contiguous rows.
    x_tm = jnp.transpose(x, (1, 0, 2)).reshape(T * B, I).astype(jnp.bfloat16)

    cost = pl.CostEstimate(
        flops=2 * T * B * I * G + 2 * T * B * Hp * G + 2 * B * Hp * Op,
        transcendentals=T * B * 5 * Hp + B * Op,
        bytes_accessed=(T * B * I * 2 + I * G * 2 + Hp * G * 2 + G * 4
                        + Hp * Op * 4 + Op * 4 + B * Op * 4),
    )

    out_padded = pl.pallas_call(
        _lstm_classifier_kernel,
        out_shape=jax.ShapeDtypeStruct((B, Op), jnp.float32),
        in_specs=[
            pl.BlockSpec(memory_space=pltpu.MemorySpace.VMEM),  # x (time-major)
            pl.BlockSpec(memory_space=pltpu.MemorySpace.VMEM),  # W_ih^T
            pl.BlockSpec(memory_space=pltpu.MemorySpace.VMEM),  # W_hh^T
            pl.BlockSpec(memory_space=pltpu.MemorySpace.VMEM),  # bias
            pl.BlockSpec(memory_space=pltpu.MemorySpace.VMEM),  # dense W^T
            pl.BlockSpec(memory_space=pltpu.MemorySpace.VMEM),  # dense bias
        ],
        out_specs=pl.BlockSpec(memory_space=pltpu.MemorySpace.VMEM),
        cost_estimate=cost,
    )(x_tm, w_ih, w_hh, b, wd, bd)

    # Strip lane padding of the dense head.
    return out_padded[:, :target_dim]


def init_params(key, lstm_input_dim, lstm_hidden_dim, target_dim):
    """Deterministic synthetic parameters matching nn.LSTM / nn.Linear shapes,
    zero-padded per gate to the 128-lane boundary and cast for the kernel."""
    I, H, O = lstm_input_dim, lstm_hidden_dim, target_dim
    Hp = _round_up(H, LANE)
    Op = _round_up(O, LANE)
    k = 1.0 / jnp.sqrt(jnp.float32(H))
    keys = jax.random.split(key, 6)
    # PyTorch shapes: weight_ih_l0 (4H, I), weight_hh_l0 (4H, H),
    #                 bias_ih_l0 (4H,), bias_hh_l0 (4H,),
    #                 dense.weight (O, H), dense.bias (O,).  Gate order i,f,g,o.
    w_ih = jax.random.uniform(keys[0], (4 * H, I), jnp.float32, -k, k)
    w_hh = jax.random.uniform(keys[1], (4 * H, H), jnp.float32, -k, k)
    b_ih = jax.random.uniform(keys[2], (4 * H,), jnp.float32, -k, k)
    b_hh = jax.random.uniform(keys[3], (4 * H,), jnp.float32, -k, k)
    w_dense = jax.random.uniform(keys[4], (O, H), jnp.float32, -k, k)
    b_dense = jax.random.uniform(keys[5], (O,), jnp.float32, -k, k)

    def pad_gate_cols(w_t):
        # (rows, 4H) -> (rows, 4Hp): each gate block zero-padded H -> Hp.
        rows = w_t.shape[0]
        out = jnp.zeros((rows, 4 * Hp), w_t.dtype)
        for g in range(4):
            out = out.at[:, g * Hp:g * Hp + H].set(w_t[:, g * H:(g + 1) * H])
        return out

    w_ih_t_pad = pad_gate_cols(w_ih.T)                                 # (I, 4Hp)
    w_hh_t_pad = jnp.zeros((Hp, 4 * Hp), jnp.float32).at[:H, :].set(
        pad_gate_cols(w_hh.T))                                         # (Hp, 4Hp)
    b_pad = pad_gate_cols((b_ih + b_hh).reshape(1, 4 * H))             # (1, 4Hp)
    w_dense_t_pad = jnp.zeros((Hp, Op), jnp.float32).at[:H, :O].set(w_dense.T)
    b_dense_pad = jnp.zeros((1, Op), jnp.float32).at[0, :O].set(b_dense)

    return {
        "w_ih_t_pad": w_ih_t_pad.astype(jnp.bfloat16),
        "w_hh_t_pad": w_hh_t_pad.astype(jnp.bfloat16),
        "b_pad": b_pad,
        "w_dense_t_pad": w_dense_t_pad,
        "b_dense_pad": b_dense_pad,
        "hidden_dim": H,
        "target_dim": O,
    }


if __name__ == "__main__":
    lstm_input_dim = 8
    lstm_hidden_dim = 16
    target_dim = 1
    batch = 2
    seq_len = 8

    key = jax.random.PRNGKey(0)
    k_x, k_p = jax.random.split(key)

    # X_input is (batch, seq, feature) = batch_first LSTM input.
    x = jax.random.normal(k_x, (batch, seq_len, lstm_input_dim), jnp.float32)
    params = init_params(k_p, lstm_input_dim, lstm_hidden_dim, target_dim)

    out = lstm_classifier_forward(x, params)
    out = jax.block_until_ready(out)

    assert out.shape == (batch, target_dim)
    assert out.dtype == jnp.float32
    print("KERNEL_OK")
</pallas_src>

<mosaic_0001>
module attributes {stable_mosaic.version = 11 : i64} {
  func.func @_lstm_classifier_kernel(%arg0: memref<16x8xbf16, #tpu.memory_space<vmem>>, %arg1: memref<8x512xbf16, #tpu.memory_space<vmem>>, %arg2: memref<128x512xbf16, #tpu.memory_space<vmem>>, %arg3: memref<1x512xf32, #tpu.memory_space<vmem>>, %arg4: memref<128x128xf32, #tpu.memory_space<vmem>>, %arg5: memref<1x128xf32, #tpu.memory_space<vmem>>, %arg6: memref<2x128xf32, #tpu.memory_space<vmem>>) attributes {dimension_semantics = [], scalar_prefetch = 0 : i64, scratch_operands = 0 : i64, tpu.core_type = #tpu.core_type<tc>} {
    %c0 = arith.constant 0 : index
    %c0_0 = arith.constant 0 : index
    %0 = vector.load %arg0[%c0, %c0_0] : memref<16x8xbf16, #tpu.memory_space<vmem>>, vector<16x8xbf16>
    %c0_1 = arith.constant 0 : index
    %c0_2 = arith.constant 0 : index
    %1 = vector.load %arg1[%c0_1, %c0_2] : memref<8x512xbf16, #tpu.memory_space<vmem>>, vector<8x512xbf16>
    %cst = arith.constant dense<0.000000e+00> : vector<16x512xf32>
    %2 = tpu.matmul %0, %1, %cst {dimension_numbers = #tpu.dot_dimension_numbers<[1], [0], [0], [1], [0, 0, 1, 1], [], []>} : vector<16x8xbf16>, vector<8x512xbf16>, vector<16x512xf32> -> vector<16x512xf32>
    %c0_3 = arith.constant 0 : index
    %c0_4 = arith.constant 0 : index
    %3 = vector.load %arg3[%c0_3, %c0_4] : memref<1x512xf32, #tpu.memory_space<vmem>>, vector<1x512xf32>
    %4 = vector.broadcast %3 : vector<1x512xf32> to vector<16x512xf32>
    %5 = arith.addf %2, %4 : vector<16x512xf32>
    %cst_5 = arith.constant 0.000000e+00 : f32
    %6 = vector.broadcast %cst_5 : f32 to vector<2x128xf32>
    %cst_6 = arith.constant 0.000000e+00 : f32
    %7 = vector.broadcast %cst_6 : f32 to vector<2x128xf32>
    %8 = vector.extract_strided_slice %5 {offsets = [0, 0], sizes = [2, 512], strides = [1, 1]} : vector<16x512xf32> to vector<2x512xf32>
    %9 = arith.truncf %6 : vector<2x128xf32> to vector<2x128xbf16>
    %c0_7 = arith.constant 0 : index
    %c0_8 = arith.constant 0 : index
    %10 = vector.load %arg2[%c0_7, %c0_8] : memref<128x512xbf16, #tpu.memory_space<vmem>>, vector<128x512xbf16>
    %cst_9 = arith.constant dense<0.000000e+00> : vector<2x512xf32>
    %11 = tpu.matmul %9, %10, %cst_9 {dimension_numbers = #tpu.dot_dimension_numbers<[1], [0], [0], [1], [0, 0, 1, 1], [], []>} : vector<2x128xbf16>, vector<128x512xbf16>, vector<2x512xf32> -> vector<2x512xf32>
    %12 = arith.addf %8, %11 : vector<2x512xf32>
    %13 = vector.extract_strided_slice %12 {offsets = [0, 0], sizes = [2, 128], strides = [1, 1]} : vector<2x512xf32> to vector<2x128xf32>
    %14 = arith.negf %13 : vector<2x128xf32>
    %15 = math.exp %14 : vector<2x128xf32>
    %cst_10 = arith.constant 1.000000e+00 : f32
    %16 = vector.broadcast %cst_10 : f32 to vector<2x128xf32>
    %17 = arith.addf %16, %15 : vector<2x128xf32>
    %18 = arith.divf %16, %17 : vector<2x128xf32>
    %19 = vector.extract_strided_slice %12 {offsets = [0, 128], sizes = [2, 128], strides = [1, 1]} : vector<2x512xf32> to vector<2x128xf32>
    %20 = arith.negf %19 : vector<2x128xf32>
    %21 = math.exp %20 : vector<2x128xf32>
    %cst_11 = arith.constant 1.000000e+00 : f32
    %22 = vector.broadcast %cst_11 : f32 to vector<2x128xf32>
    %23 = arith.addf %22, %21 : vector<2x128xf32>
    %24 = arith.divf %22, %23 : vector<2x128xf32>
    %25 = vector.extract_strided_slice %12 {offsets = [0, 256], sizes = [2, 128], strides = [1, 1]} : vector<2x512xf32> to vector<2x128xf32>
    %26 = math.tanh %25 : vector<2x128xf32>
    %27 = vector.extract_strided_slice %12 {offsets = [0, 384], sizes = [2, 128], strides = [1, 1]} : vector<2x512xf32> to vector<2x128xf32>
    %28 = arith.negf %27 : vector<2x128xf32>
    %29 = math.exp %28 : vector<2x128xf32>
    %cst_12 = arith.constant 1.000000e+00 : f32
    %30 = vector.broadcast %cst_12 : f32 to vector<2x128xf32>
    %31 = arith.addf %30, %29 : vector<2x128xf32>
    %32 = arith.divf %30, %31 : vector<2x128xf32>
    %33 = arith.mulf %24, %7 : vector<2x128xf32>
    %34 = arith.mulf %18, %26 : vector<2x128xf32>
    %35 = arith.addf %33, %34 : vector<2x128xf32>
    %36 = math.tanh %35 : vector<2x128xf32>
    %37 = arith.mulf %32, %36 : vector<2x128xf32>
    %38 = vector.extract_strided_slice %5 {offsets = [2, 0], sizes = [2, 512], strides = [1, 1]} : vector<16x512xf32> to vector<2x512xf32>
    %39 = arith.truncf %37 : vector<2x128xf32> to vector<2x128xbf16>
    %c0_13 = arith.constant 0 : index
    %c0_14 = arith.constant 0 : index
    %40 = vector.load %arg2[%c0_13, %c0_14] : memref<128x512xbf16, #tpu.memory_space<vmem>>, vector<128x512xbf16>
    %cst_15 = arith.constant dense<0.000000e+00> : vector<2x512xf32>
    %41 = tpu.matmul %39, %40, %cst_15 {dimension_numbers = #tpu.dot_dimension_numbers<[1], [0], [0], [1], [0, 0, 1, 1], [], []>} : vector<2x128xbf16>, vector<128x512xbf16>, vector<2x512xf32> -> vector<2x512xf32>
    %42 = arith.addf %38, %41 : vector<2x512xf32>
    %43 = vector.extract_strided_slice %42 {offsets = [0, 0], sizes = [2, 128], strides = [1, 1]} : vector<2x512xf32> to vector<2x128xf32>
    %44 = arith.negf %43 : vector<2x128xf32>
    %45 = math.exp %44 : vector<2x128xf32>
    %cst_16 = arith.constant 1.000000e+00 : f32
    %46 = vector.broadcast %cst_16 : f32 to vector<2x128xf32>
    %47 = arith.addf %46, %45 : vector<2x128xf32>
    %48 = arith.divf %46, %47 : vector<2x128xf32>
    %49 = vector.extract_strided_slice %42 {offsets = [0, 128], sizes = [2, 128], strides = [1, 1]} : vector<2x512xf32> to vector<2x128xf32>
    %50 = arith.negf %49 : vector<2x128xf32>
    %51 = math.exp %50 : vector<2x128xf32>
    %cst_17 = arith.constant 1.000000e+00 : f32
    %52 = vector.broadcast %cst_17 : f32 to vector<2x128xf32>
    %53 = arith.addf %52, %51 : vector<2x128xf32>
    %54 = arith.divf %52, %53 : vector<2x128xf32>
    %55 = vector.extract_strided_slice %42 {offsets = [0, 256], sizes = [2, 128], strides = [1, 1]} : vector<2x512xf32> to vector<2x128xf32>
    %56 = math.tanh %55 : vector<2x128xf32>
    %57 = vector.extract_strided_slice %42 {offsets = [0, 384], sizes = [2, 128], strides = [1, 1]} : vector<2x512xf32> to vector<2x128xf32>
    %58 = arith.negf %57 : vector<2x128xf32>
    %59 = math.exp %58 : vector<2x128xf32>
    %cst_18 = arith.constant 1.000000e+00 : f32
    %60 = vector.broadcast %cst_18 : f32 to vector<2x128xf32>
    %61 = arith.addf %60, %59 : vector<2x128xf32>
    %62 = arith.divf %60, %61 : vector<2x128xf32>
    %63 = arith.mulf %54, %35 : vector<2x128xf32>
    %64 = arith.mulf %48, %56 : vector<2x128xf32>
    %65 = arith.addf %63, %64 : vector<2x128xf32>
    %66 = math.tanh %65 : vector<2x128xf32>
    %67 = arith.mulf %62, %66 : vector<2x128xf32>
    %68 = vector.extract_strided_slice %5 {offsets = [4, 0], sizes = [2, 512], strides = [1, 1]} : vector<16x512xf32> to vector<2x512xf32>
    %69 = arith.truncf %67 : vector<2x128xf32> to vector<2x128xbf16>
    %c0_19 = arith.constant 0 : index
    %c0_20 = arith.constant 0 : index
    %70 = vector.load %arg2[%c0_19, %c0_20] : memref<128x512xbf16, #tpu.memory_space<vmem>>, vector<128x512xbf16>
    %cst_21 = arith.constant dense<0.000000e+00> : vector<2x512xf32>
    %71 = tpu.matmul %69, %70, %cst_21 {dimension_numbers = #tpu.dot_dimension_numbers<[1], [0], [0], [1], [0, 0, 1, 1], [], []>} : vector<2x128xbf16>, vector<128x512xbf16>, vector<2x512xf32> -> vector<2x512xf32>
    %72 = arith.addf %68, %71 : vector<2x512xf32>
    %73 = vector.extract_strided_slice %72 {offsets = [0, 0], sizes = [2, 128], strides = [1, 1]} : vector<2x512xf32> to vector<2x128xf32>
    %74 = arith.negf %73 : vector<2x128xf32>
    %75 = math.exp %74 : vector<2x128xf32>
    %cst_22 = arith.constant 1.000000e+00 : f32
    %76 = vector.broadcast %cst_22 : f32 to vector<2x128xf32>
    %77 = arith.addf %76, %75 : vector<2x128xf32>
    %78 = arith.divf %76, %77 : vector<2x128xf32>
    %79 = vector.extract_strided_slice %72 {offsets = [0, 128], sizes = [2, 128], strides = [1, 1]} : vector<2x512xf32> to vector<2x128xf32>
    %80 = arith.negf %79 : vector<2x128xf32>
    %81 = math.exp %80 : vector<2x128xf32>
    %cst_23 = arith.constant 1.000000e+00 : f32
    %82 = vector.broadcast %cst_23 : f32 to vector<2x128xf32>
    %83 = arith.addf %82, %81 : vector<2x128xf32>
    %84 = arith.divf %82, %83 : vector<2x128xf32>
    %85 = vector.extract_strided_slice %72 {offsets = [0, 256], sizes = [2, 128], strides = [1, 1]} : vector<2x512xf32> to vector<2x128xf32>
    %86 = math.tanh %85 : vector<2x128xf32>
    %87 = vector.extract_strided_slice %72 {offsets = [0, 384], sizes = [2, 128], strides = [1, 1]} : vector<2x512xf32> to vector<2x128xf32>
    %88 = arith.negf %87 : vector<2x128xf32>
    %89 = math.exp %88 : vector<2x128xf32>
    %cst_24 = arith.constant 1.000000e+00 : f32
    %90 = vector.broadcast %cst_24 : f32 to vector<2x128xf32>
    %91 = arith.addf %90, %89 : vector<2x128xf32>
    %92 = arith.divf %90, %91 : vector<2x128xf32>
    %93 = arith.mulf %84, %65 : vector<2x128xf32>
    %94 = arith.mulf %78, %86 : vector<2x128xf32>
    %95 = arith.addf %93, %94 : vector<2x128xf32>
    %96 = math.tanh %95 : vector<2x128xf32>
    %97 = arith.mulf %92, %96 : vector<2x128xf32>
    %98 = vector.extract_strided_slice %5 {offsets = [6, 0], sizes = [2, 512], strides = [1, 1]} : vector<16x512xf32> to vector<2x512xf32>
    %99 = arith.truncf %97 : vector<2x128xf32> to vector<2x128xbf16>
    %c0_25 = arith.constant 0 : index
    %c0_26 = arith.constant 0 : index
    %100 = vector.load %arg2[%c0_25, %c0_26] : memref<128x512xbf16, #tpu.memory_space<vmem>>, vector<128x512xbf16>
    %cst_27 = arith.constant dense<0.000000e+00> : vector<2x512xf32>
    %101 = tpu.matmul %99, %100, %cst_27 {dimension_numbers = #tpu.dot_dimension_numbers<[1], [0], [0], [1], [0, 0, 1, 1], [], []>} : vector<2x128xbf16>, vector<128x512xbf16>, vector<2x512xf32> -> vector<2x512xf32>
    %102 = arith.addf %98, %101 : vector<2x512xf32>
    %103 = vector.extract_strided_slice %102 {offsets = [0, 0], sizes = [2, 128], strides = [1, 1]} : vector<2x512xf32> to vector<2x128xf32>
    %104 = arith.negf %103 : vector<2x128xf32>
    %105 = math.exp %104 : vector<2x128xf32>
    %cst_28 = arith.constant 1.000000e+00 : f32
    %106 = vector.broadcast %cst_28 : f32 to vector<2x128xf32>
    %107 = arith.addf %106, %105 : vector<2x128xf32>
    %108 = arith.divf %106, %107 : vector<2x128xf32>
    %109 = vector.extract_strided_slice %102 {offsets = [0, 128], sizes = [2, 128], strides = [1, 1]} : vector<2x512xf32> to vector<2x128xf32>
    %110 = arith.negf %109 : vector<2x128xf32>
    %111 = math.exp %110 : vector<2x128xf32>
    %cst_29 = arith.constant 1.000000e+00 : f32
    %112 = vector.broadcast %cst_29 : f32 to vector<2x128xf32>
    %113 = arith.addf %112, %111 : vector<2x128xf32>
    %114 = arith.divf %112, %113 : vector<2x128xf32>
    %115 = vector.extract_strided_slice %102 {offsets = [0, 256], sizes = [2, 128], strides = [1, 1]} : vector<2x512xf32> to vector<2x128xf32>
    %116 = math.tanh %115 : vector<2x128xf32>
    %117 = vector.extract_strided_slice %102 {offsets = [0, 384], sizes = [2, 128], strides = [1, 1]} : vector<2x512xf32> to vector<2x128xf32>
    %118 = arith.negf %117 : vector<2x128xf32>
    %119 = math.exp %118 : vector<2x128xf32>
    %cst_30 = arith.constant 1.000000e+00 : f32
    %120 = vector.broadcast %cst_30 : f32 to vector<2x128xf32>
    %121 = arith.addf %120, %119 : vector<2x128xf32>
    %122 = arith.divf %120, %121 : vector<2x128xf32>
    %123 = arith.mulf %114, %95 : vector<2x128xf32>
    %124 = arith.mulf %108, %116 : vector<2x128xf32>
    %125 = arith.addf %123, %124 : vector<2x128xf32>
    %126 = math.tanh %125 : vector<2x128xf32>
    %127 = arith.mulf %122, %126 : vector<2x128xf32>
    %128 = vector.extract_strided_slice %5 {offsets = [8, 0], sizes = [2, 512], strides = [1, 1]} : vector<16x512xf32> to vector<2x512xf32>
    %129 = arith.truncf %127 : vector<2x128xf32> to vector<2x128xbf16>
    %c0_31 = arith.constant 0 : index
    %c0_32 = arith.constant 0 : index
    %130 = vector.load %arg2[%c0_31, %c0_32] : memref<128x512xbf16, #tpu.memory_space<vmem>>, vector<128x512xbf16>
    %cst_33 = arith.constant dense<0.000000e+00> : vector<2x512xf32>
    %131 = tpu.matmul %129, %130, %cst_33 {dimension_numbers = #tpu.dot_dimension_numbers<[1], [0], [0], [1], [0, 0, 1, 1], [], []>} : vector<2x128xbf16>, vector<128x512xbf16>, vector<2x512xf32> -> vector<2x512xf32>
    %132 = arith.addf %128, %131 : vector<2x512xf32>
    %133 = vector.extract_strided_slice %132 {offsets = [0, 0], sizes = [2, 128], strides = [1, 1]} : vector<2x512xf32> to vector<2x128xf32>
    %134 = arith.negf %133 : vector<2x128xf32>
    %135 = math.exp %134 : vector<2x128xf32>
    %cst_34 = arith.constant 1.000000e+00 : f32
    %136 = vector.broadcast %cst_34 : f32 to vector<2x128xf32>
    %137 = arith.addf %136, %135 : vector<2x128xf32>
    %138 = arith.divf %136, %137 : vector<2x128xf32>
    %139 = vector.extract_strided_slice %132 {offsets = [0, 128], sizes = [2, 128], strides = [1, 1]} : vector<2x512xf32> to vector<2x128xf32>
    %140 = arith.negf %139 : vector<2x128xf32>
    %141 = math.exp %140 : vector<2x128xf32>
    %cst_35 = arith.constant 1.000000e+00 : f32
    %142 = vector.broadcast %cst_35 : f32 to vector<2x128xf32>
    %143 = arith.addf %142, %141 : vector<2x128xf32>
    %144 = arith.divf %142, %143 : vector<2x128xf32>
    %145 = vector.extract_strided_slice %132 {offsets = [0, 256], sizes = [2, 128], strides = [1, 1]} : vector<2x512xf32> to vector<2x128xf32>
    %146 = math.tanh %145 : vector<2x128xf32>
    %147 = vector.extract_strided_slice %132 {offsets = [0, 384], sizes = [2, 128], strides = [1, 1]} : vector<2x512xf32> to vector<2x128xf32>
    %148 = arith.negf %147 : vector<2x128xf32>
    %149 = math.exp %148 : vector<2x128xf32>
    %cst_36 = arith.constant 1.000000e+00 : f32
    %150 = vector.broadcast %cst_36 : f32 to vector<2x128xf32>
    %151 = arith.addf %150, %149 : vector<2x128xf32>
    %152 = arith.divf %150, %151 : vector<2x128xf32>
    %153 = arith.mulf %144, %125 : vector<2x128xf32>
    %154 = arith.mulf %138, %146 : vector<2x128xf32>
    %155 = arith.addf %153, %154 : vector<2x128xf32>
    %156 = math.tanh %155 : vector<2x128xf32>
    %157 = arith.mulf %152, %156 : vector<2x128xf32>
    %158 = vector.extract_strided_slice %5 {offsets = [10, 0], sizes = [2, 512], strides = [1, 1]} : vector<16x512xf32> to vector<2x512xf32>
    %159 = arith.truncf %157 : vector<2x128xf32> to vector<2x128xbf16>
    %c0_37 = arith.constant 0 : index
    %c0_38 = arith.constant 0 : index
    %160 = vector.load %arg2[%c0_37, %c0_38] : memref<128x512xbf16, #tpu.memory_space<vmem>>, vector<128x512xbf16>
    %cst_39 = arith.constant dense<0.000000e+00> : vector<2x512xf32>
    %161 = tpu.matmul %159, %160, %cst_39 {dimension_numbers = #tpu.dot_dimension_numbers<[1], [0], [0], [1], [0, 0, 1, 1], [], []>} : vector<2x128xbf16>, vector<128x512xbf16>, vector<2x512xf32> -> vector<2x512xf32>
    %162 = arith.addf %158, %161 : vector<2x512xf32>
    %163 = vector.extract_strided_slice %162 {offsets = [0, 0], sizes = [2, 128], strides = [1, 1]} : vector<2x512xf32> to vector<2x128xf32>
    %164 = arith.negf %163 : vector<2x128xf32>
    %165 = math.exp %164 : vector<2x128xf32>
    %cst_40 = arith.constant 1.000000e+00 : f32
    %166 = vector.broadcast %cst_40 : f32 to vector<2x128xf32>
    %167 = arith.addf %166, %165 : vector<2x128xf32>
    %168 = arith.divf %166, %167 : vector<2x128xf32>
    %169 = vector.extract_strided_slice %162 {offsets = [0, 128], sizes = [2, 128], strides = [1, 1]} : vector<2x512xf32> to vector<2x128xf32>
    %170 = arith.negf %169 : vector<2x128xf32>
    %171 = math.exp %170 : vector<2x128xf32>
    %cst_41 = arith.constant 1.000000e+00 : f32
    %172 = vector.broadcast %cst_41 : f32 to vector<2x128xf32>
    %173 = arith.addf %172, %171 : vector<2x128xf32>
    %174 = arith.divf %172, %173 : vector<2x128xf32>
    %175 = vector.extract_strided_slice %162 {offsets = [0, 256], sizes = [2, 128], strides = [1, 1]} : vector<2x512xf32> to vector<2x128xf32>
    %176 = math.tanh %175 : vector<2x128xf32>
    %177 = vector.extract_strided_slice %162 {offsets = [0, 384], sizes = [2, 128], strides = [1, 1]} : vector<2x512xf32> to vector<2x128xf32>
    %178 = arith.negf %177 : vector<2x128xf32>
    %179 = math.exp %178 : vector<2x128xf32>
    %cst_42 = arith.constant 1.000000e+00 : f32
    %180 = vector.broadcast %cst_42 : f32 to vector<2x128xf32>
    %181 = arith.addf %180, %179 : vector<2x128xf32>
    %182 = arith.divf %180, %181 : vector<2x128xf32>
    %183 = arith.mulf %174, %155 : vector<2x128xf32>
    %184 = arith.mulf %168, %176 : vector<2x128xf32>
    %185 = arith.addf %183, %184 : vector<2x128xf32>
    %186 = math.tanh %185 : vector<2x128xf32>
    %187 = arith.mulf %182, %186 : vector<2x128xf32>
    %188 = vector.extract_strided_slice %5 {offsets = [12, 0], sizes = [2, 512], strides = [1, 1]} : vector<16x512xf32> to vector<2x512xf32>
    %189 = arith.truncf %187 : vector<2x128xf32> to vector<2x128xbf16>
    %c0_43 = arith.constant 0 : index
    %c0_44 = arith.constant 0 : index
    %190 = vector.load %arg2[%c0_43, %c0_44] : memref<128x512xbf16, #tpu.memory_space<vmem>>, vector<128x512xbf16>
    %cst_45 = arith.constant dense<0.000000e+00> : vector<2x512xf32>
    %191 = tpu.matmul %189, %190, %cst_45 {dimension_numbers = #tpu.dot_dimension_numbers<[1], [0], [0], [1], [0, 0, 1, 1], [], []>} : vector<2x128xbf16>, vector<128x512xbf16>, vector<2x512xf32> -> vector<2x512xf32>
    %192 = arith.addf %188, %191 : vector<2x512xf32>
    %193 = vector.extract_strided_slice %192 {offsets = [0, 0], sizes = [2, 128], strides = [1, 1]} : vector<2x512xf32> to vector<2x128xf32>
    %194 = arith.negf %193 : vector<2x128xf32>
    %195 = math.exp %194 : vector<2x128xf32>
    %cst_46 = arith.constant 1.000000e+00 : f32
    %196 = vector.broadcast %cst_46 : f32 to vector<2x128xf32>
    %197 = arith.addf %196, %195 : vector<2x128xf32>
    %198 = arith.divf %196, %197 : vector<2x128xf32>
    %199 = vector.extract_strided_slice %192 {offsets = [0, 128], sizes = [2, 128], strides = [1, 1]} : vector<2x512xf32> to vector<2x128xf32>
    %200 = arith.negf %199 : vector<2x128xf32>
    %201 = math.exp %200 : vector<2x128xf32>
    %cst_47 = arith.constant 1.000000e+00 : f32
    %202 = vector.broadcast %cst_47 : f32 to vector<2x128xf32>
    %203 = arith.addf %202, %201 : vector<2x128xf32>
    %204 = arith.divf %202, %203 : vector<2x128xf32>
    %205 = vector.extract_strided_slice %192 {offsets = [0, 256], sizes = [2, 128], strides = [1, 1]} : vector<2x512xf32> to vector<2x128xf32>
    %206 = math.tanh %205 : vector<2x128xf32>
    %207 = vector.extract_strided_slice %192 {offsets = [0, 384], sizes = [2, 128], strides = [1, 1]} : vector<2x512xf32> to vector<2x128xf32>
    %208 = arith.negf %207 : vector<2x128xf32>
    %209 = math.exp %208 : vector<2x128xf32>
    %cst_48 = arith.constant 1.000000e+00 : f32
    %210 = vector.broadcast %cst_48 : f32 to vector<2x128xf32>
    %211 = arith.addf %210, %209 : vector<2x128xf32>
    %212 = arith.divf %210, %211 : vector<2x128xf32>
    %213 = arith.mulf %204, %185 : vector<2x128xf32>
    %214 = arith.mulf %198, %206 : vector<2x128xf32>
    %215 = arith.addf %213, %214 : vector<2x128xf32>
    %216 = math.tanh %215 : vector<2x128xf32>
    %217 = arith.mulf %212, %216 : vector<2x128xf32>
    %218 = vector.extract_strided_slice %5 {offsets = [14, 0], sizes = [2, 512], strides = [1, 1]} : vector<16x512xf32> to vector<2x512xf32>
    %219 = arith.truncf %217 : vector<2x128xf32> to vector<2x128xbf16>
    %c0_49 = arith.constant 0 : index
    %c0_50 = arith.constant 0 : index
    %220 = vector.load %arg2[%c0_49, %c0_50] : memref<128x512xbf16, #tpu.memory_space<vmem>>, vector<128x512xbf16>
    %cst_51 = arith.constant dense<0.000000e+00> : vector<2x512xf32>
    %221 = tpu.matmul %219, %220, %cst_51 {dimension_numbers = #tpu.dot_dimension_numbers<[1], [0], [0], [1], [0, 0, 1, 1], [], []>} : vector<2x128xbf16>, vector<128x512xbf16>, vector<2x512xf32> -> vector<2x512xf32>
    %222 = arith.addf %218, %221 : vector<2x512xf32>
    %223 = vector.extract_strided_slice %222 {offsets = [0, 0], sizes = [2, 128], strides = [1, 1]} : vector<2x512xf32> to vector<2x128xf32>
    %224 = arith.negf %223 : vector<2x128xf32>
    %225 = math.exp %224 : vector<2x128xf32>
    %cst_52 = arith.constant 1.000000e+00 : f32
    %226 = vector.broadcast %cst_52 : f32 to vector<2x128xf32>
    %227 = arith.addf %226, %225 : vector<2x128xf32>
    %228 = arith.divf %226, %227 : vector<2x128xf32>
    %229 = vector.extract_strided_slice %222 {offsets = [0, 128], sizes = [2, 128], strides = [1, 1]} : vector<2x512xf32> to vector<2x128xf32>
    %230 = arith.negf %229 : vector<2x128xf32>
    %231 = math.exp %230 : vector<2x128xf32>
    %cst_53 = arith.constant 1.000000e+00 : f32
    %232 = vector.broadcast %cst_53 : f32 to vector<2x128xf32>
    %233 = arith.addf %232, %231 : vector<2x128xf32>
    %234 = arith.divf %232, %233 : vector<2x128xf32>
    %235 = vector.extract_strided_slice %222 {offsets = [0, 256], sizes = [2, 128], strides = [1, 1]} : vector<2x512xf32> to vector<2x128xf32>
    %236 = math.tanh %235 : vector<2x128xf32>
    %237 = vector.extract_strided_slice %222 {offsets = [0, 384], sizes = [2, 128], strides = [1, 1]} : vector<2x512xf32> to vector<2x128xf32>
    %238 = arith.negf %237 : vector<2x128xf32>
    %239 = math.exp %238 : vector<2x128xf32>
    %cst_54 = arith.constant 1.000000e+00 : f32
    %240 = vector.broadcast %cst_54 : f32 to vector<2x128xf32>
    %241 = arith.addf %240, %239 : vector<2x128xf32>
    %242 = arith.divf %240, %241 : vector<2x128xf32>
    %243 = arith.mulf %234, %215 : vector<2x128xf32>
    %244 = arith.mulf %228, %236 : vector<2x128xf32>
    %245 = arith.addf %243, %244 : vector<2x128xf32>
    %246 = math.tanh %245 : vector<2x128xf32>
    %247 = arith.mulf %242, %246 : vector<2x128xf32>
    %c0_55 = arith.constant 0 : index
    %c0_56 = arith.constant 0 : index
    %248 = vector.load %arg4[%c0_55, %c0_56] : memref<128x128xf32, #tpu.memory_space<vmem>>, vector<128x128xf32>
    %cst_57 = arith.constant dense<0.000000e+00> : vector<2x128xf32>
    %249 = tpu.matmul %247, %248, %cst_57 {dimension_numbers = #tpu.dot_dimension_numbers<[1], [0], [0], [1], [0, 0, 1, 1], [], []>} : vector<2x128xf32>, vector<128x128xf32>, vector<2x128xf32> -> vector<2x128xf32>
    %c0_58 = arith.constant 0 : index
    %c0_59 = arith.constant 0 : index
    %250 = vector.load %arg5[%c0_58, %c0_59] : memref<1x128xf32, #tpu.memory_space<vmem>>, vector<1x128xf32>
    %251 = vector.broadcast %250 : vector<1x128xf32> to vector<2x128xf32>
    %252 = arith.addf %249, %251 : vector<2x128xf32>
    %253 = arith.negf %252 : vector<2x128xf32>
    %254 = math.exp %253 : vector<2x128xf32>
    %cst_60 = arith.constant 1.000000e+00 : f32
    %255 = vector.broadcast %cst_60 : f32 to vector<2x128xf32>
    %256 = arith.addf %255, %254 : vector<2x128xf32>
    %257 = arith.divf %255, %256 : vector<2x128xf32>
    %c0_61 = arith.constant 0 : index
    %c0_62 = arith.constant 0 : index
    %258 = vector.load %arg6[%c0_61, %c0_62] : memref<2x128xf32, #tpu.memory_space<vmem>>, vector<2x128xf32>
    tpu.vector_store %arg6[%c0_61, %c0_62], %257 {strides = array<i32>} : memref<2x128xf32, #tpu.memory_space<vmem>>, vector<2x128xf32>,
    return
  }
}

</mosaic_0001>

<bundles_post_ra>
// kernel: tpu_custom_call.1
= control target key start
LH: loop header
LB: loop body
LE: loop exit
PB: predicated region body
PF: predicated region fallthrough
CT: control target
= control target key end

     0   :  { %11 = vsyncpa [#allocation3], 0  ;;  %s2419_s0 = inlined_call_operand.vmem [shape: bf16[16,8], index: 0, kind: input, shape index: {}]   ;;  %s2420_s1 = inlined_call_operand.hbm [shape: bf16[8,512], index: 1, kind: input, shape index: {}]   ;;  %s2421_s2 = inlined_call_operand.hbm [shape: bf16[128,512], index: 2, kind: input, shape index: {}]   ;;  %s2422_s3 = inlined_call_operand.vmem [shape: f32[1,512], index: 3, kind: input, shape index: {}]   ;;  %s2423_s4 = inlined_call_operand.hbm [shape: f32[128,128], index: 4, kind: input, shape index: {}]   ;;  %s2424_s5 = inlined_call_operand.vmem [shape: f32[1,128], index: 5, kind: input, shape index: {}]   ;;  %s2425_s6 = inlined_call_operand.hbm [shape: f32[2,128], index: 6, kind: output, shape index: {}]  }
   0x1   :  { %12 = vsyncpa [#allocation6], 0 }
   0x2   :  { %13 = vsyncpa [#allocation4], 0  ;;  %s1947_s21 = smov [#allocation5]  }
   0x3   :  { %s31_s22 = sshll.u32 %s1947_s21, 4  ;;  %s32_s22 = int_to_ptr.vmem [resolvable:$true] %s31_s22 }
   0x4   :  { %s1869_s23 = scalar_lea.vmem %s32_s22, 4096  ;;  %p1874_p1 = scmp.lt.s32.totalorder %s32_s22, %s32_s22 }
   0x5   :  { %p1870_p0 = scmp.ne.s32.totalorder %s32_s22, %s1869_s23  ;;  %p1875_p2 = scmp.lt.s32.totalorder %s1869_s23, %s1869_s23 }
   0x7   :  { %p1876_p3 = por %p1875_p2, %p1874_p1 }
   0x9   :  { %p1877_p4 = pnand %p1876_p3, %p1870_p0 }
   0xb   :  { %1880 = shalt.err (!%p1877_p4)
}
   0xc   :  { %s1948_s24 = smov 256   ;;  %s1949_s25 = smov 16  }
   0xd   :  { %37 = dma.hbm_to_vmem [thread:$0]  %s2421_s2, 4096, %s32_s22, [#allocation6], %s1948_s24, %s1948_s24, %s1949_s25  }
   0xe   :  { %s1950_s28 = smov [#allocation2]   ;;  %s1951_s30 = smov [#allocation7]  }
   0xf   :  { %s22_s29 = sshll.u32 %s1950_s28, 4  ;;  %s45_s7 = sshll.u32 %s1951_s30, 4  ;;  %s23_s29 = int_to_ptr.vmem [resolvable:$true] %s22_s29  ;;  %s46_s7 = int_to_ptr.vmem [resolvable:$true] %s45_s7 }
  0x10   :  { %s1889_s8 = scalar_lea.vmem %s23_s29, 256  ;;  %p1894_p6 = scmp.lt.s32.totalorder %s23_s29, %s23_s29 }
  0x11   :  { %p1890_p5 = scmp.ne.s32.totalorder %s23_s29, %s1889_s8  ;;  %p1895_p7 = scmp.lt.s32.totalorder %s1889_s8, %s1889_s8 }
  0x13   :  { %p1896_p8 = por %p1895_p7, %p1894_p6 }
  0x15   :  { %p1897_p9 = pnand %p1896_p8, %p1890_p5 }
  0x17   :  { %1900 = shalt.err (!%p1897_p9)
}
  0x18   :  { %25 = dma.hbm_to_vmem [thread:$0]  %s2420_s1, 256, %s23_s29, [#allocation3]  }
  0x19   :  { %s1909_s11 = scalar_lea.vmem %s46_s7, 2048  ;;  %p1914_p11 = scmp.lt.s32.totalorder %s46_s7, %s46_s7 }
  0x1a   :  { %p1910_p10 = scmp.ne.s32.totalorder %s46_s7, %s1909_s11  ;;  %p1915_p12 = scmp.lt.s32.totalorder %s1909_s11, %s1909_s11 }
  0x1c   :  { %p1916_p13 = por %p1915_p12, %p1914_p11 }
  0x1e   :  { %p1917_p0 = pnand %p1916_p13, %p1910_p10 }
  0x20   :  { %1920 = shalt.err (!%p1917_p0)
}
  0x21   :  { %s1952_s2 = smov 128   ;;  %s1953_s12 = smov 8  }
  0x22   :  { %51 = dma.hbm_to_vmem [thread:$0]  %s2423_s4, 2048, %s46_s7, [#allocation6], %s1952_s2, %s1952_s2, %s1953_s12  }
  0x23   :  { %1941 = dma.done.wait [#allocation3], 256  }
  0x24   :  { %1942 = vsyncadd [#allocation3], 4294967040 }
  0x25   :  { %1943 = dma.done.wait [#allocation6], 6144  }
  0x26   :  { %1944 = vsyncadd [#allocation6], 4294961152  ;;  %v1954_v0 = vmov 0   ;;  %v66_v1 = vld [vmem:[#allocation2] sm:$0xff]  ;;  %vm109_vm0 = vcmask 1043456   ;;  %vm105_vm1 = vcmask 64512   ;;  %v70_v42 = vlaneseq }
  0x27   :  { %154 = vmatprep.mubr.bf16.mxu1 %v1954_v0  ;;  %432 = vmatprep.mubr.bf16.mxu0 %v1954_v0  ;;  %v1516_v2 = vcombine.high %v66_v1, %v66_v1  ;;  %v2004_v3 = vld [vmem:[#allocation5 + $0xe4] ss:$16 sps:$4 sm:$0xff]   ;;  %v1515_v4 = vcombine.low %v66_v1, %v66_v1  ;;  %v2006_v5 = vld [vmem:[#allocation5 + $0xe0] ss:$16 sps:$4 sm:$0xff]   ;;  %v67_v10 = vld [vmem:[#allocation2 + $0x8] sm:$0xff]  ;;  %vm1956_vm2 = vmmov 0  }
  0x28   :  { %v1649_v6 = vld [vmem:[%s2419_s0] sm:$0xff]   ;;  %400 = vmatprep.subr.bf16.mxu0 %v2004_v3  ;;  %v1518_v11 = vcombine.high %v67_v10, %v67_v10  ;;  %v1517_v12 = vcombine.low %v67_v10, %v67_v10  ;;  %v2022_v14 = vld [vmem:[#allocation5 + $0xec] ss:$16 sps:$4 sm:$0xff]   ;;  %v2035_v18 = vld [vmem:[#allocation5 + $0xe8] ss:$16 sps:$4 sm:$0xff]   ;;  %v71_v43 = vshrl.u32 %v70_v42, 7 }
  0x29   :  { %1519 = vmatprep.subr.msk.bf16.mxu1 %vm109_vm0, %v1516_v2  ;;  %v111_v7 = vsel %vm109_vm0, %v1515_v4, 0  ;;  %v2014_v8 = vld [vmem:[#allocation5 + $0xc4] ss:$16 sps:$4 sm:$0xff]   ;;  %v2016_v9 = vld [vmem:[#allocation5 + $0xc0] ss:$16 sps:$4 sm:$0xff]   ;;  %401 = vmatpush1.bf16.msra.mxu0 %v2006_v5  ;;  %s1957_s17 = smov [#allocation8]  }
  0x2a   :  { %137 = vmatpush1.bf16.msra.mxu1 %v111_v7  ;;  %402 = vmatprep.subr.bf16.mxu0 %v2014_v8  ;;  %v2020_v13 = vld [vmem:[#allocation5 + $0xa4] ss:$16 sps:$4 sm:$0xff]   ;;  %v117_v15 = vsel %vm109_vm0, %v1517_v12, 0  ;;  %v2028_v16 = vld [vmem:[#allocation5 + $0xa0] ss:$16 sps:$4 sm:$0xff]   ;;  %v72_v44 = vsub.s32 0, %v71_v43 }
  0x2b   :  { %1521 = vmatprep.subr.msk.bf16.mxu1 %vm109_vm0, %v1518_v11  ;;  %v2032_v17 = vld [vmem:[#allocation5 + $0x84] ss:$16 sps:$4 sm:$0xff]   ;;  %v2038_v19 = vld [vmem:[#allocation5 + $0x80] ss:$16 sps:$4 sm:$0xff]   ;;  %v2041_v20 = vld [vmem:[#allocation5 + $0xcc] ss:$16 sps:$4 sm:$0xff]  }
  0x2c   :  { %v2043_v21 = vld [vmem:[#allocation5 + $0x64] ss:$16 sps:$4 sm:$0xff]   ;;  %v2046_v22 = vld [vmem:[#allocation5 + $0xc8] ss:$16 sps:$4 sm:$0xff]   ;;  %v2048_v23 = vld [vmem:[#allocation5 + $0x60] ss:$16 sps:$4 sm:$0xff]  }
  0x2d   :  { %1520 = vmatmul.mubr.msk.bf16.vlgmr.msra.gmra.mxu1 %vm105_vm1, %v1649_v6  ;;  %403 = vmatpush1.bf16.msra.mxu0 %v2016_v9  ;;  %v2052_v24 = vld [vmem:[#allocation5 + $0xac] ss:$16 sps:$4 sm:$0xff]   ;;  %v2056_v25 = vld [vmem:[#allocation5 + $0x44] ss:$16 sps:$4 sm:$0xff]   ;;  %v2059_v26 = vld [vmem:[#allocation5 + $0xa8] ss:$16 sps:$4 sm:$0xff]  }
  0x2e   :  { %180 = vmatpush1.bf16.msra.mxu1 %v117_v15  ;;  %404 = vmatprep.subr.bf16.mxu0 %v2020_v13  ;;  %v2063_v27 = vld [vmem:[#allocation5 + $0x40] ss:$16 sps:$4 sm:$0xff]   ;;  %v2067_v28 = vld [vmem:[#allocation5 + $0x8c] ss:$16 sps:$4 sm:$0xff]   ;;  %v2069_v29 = vld [vmem:[#allocation5 + $0x24] ss:$16 sps:$4 sm:$0xff]  }
  0x2f   :  { %197 = vmatprep.mubr.bf16.mxu1 %v1954_v0  ;;  %441 = vmatprep.subr.bf16.mxu1 %v2022_v14  ;;  %v2073_v30 = vld [vmem:[#allocation5 + $0x88] ss:$16 sps:$4 sm:$0xff]   ;;  %v2075_v31 = vld [vmem:[#allocation5 + $0x20] ss:$16 sps:$4 sm:$0xff]   ;;  %v2079_v32 = vld [vmem:[#allocation5 + $0x6c] ss:$16 sps:$4 sm:$0xff]  }
  0x30   :  { %v2081_v33 = vld [vmem:[#allocation5 + $0x4] ss:$16 sps:$4 sm:$0xff]   ;;  %v2085_v34 = vld [vmem:[#allocation5 + $0x68] ss:$16 sps:$4 sm:$0xff]   ;;  %v2087_v35 = vld [vmem:[#allocation5] ss:$16 sps:$4 sm:$0xff]  }
  0x31   :  { %405 = vmatpush1.bf16.msra.mxu0 %v2028_v16  ;;  %v2091_v36 = vld [vmem:[#allocation5 + $0x4c] ss:$16 sps:$4 sm:$0xff]   ;;  %v2095_v37 = vld [vmem:[#allocation5 + $0x48] ss:$16 sps:$4 sm:$0xff]   ;;  %v68_v45 = vld [vmem:[%s2422_s3] sm:$0xf] }
  0x32   :  { %406 = vmatprep.subr.bf16.mxu0 %v2032_v17  ;;  %v2098_v38 = vld [vmem:[#allocation5 + $0x2c] ss:$16 sps:$4 sm:$0xff]   ;;  %v2103_v39 = vld [vmem:[#allocation5 + $0x28] ss:$16 sps:$4 sm:$0xff]   ;;  %v76_v46 = vsub.s32 1, %v71_v43  ;;  %v73_v48 = vrot.slane %v68_v45, %v72_v44  ;;  %v80_v53 = vsub.s32 2, %v71_v43 }
  0x33   :  { %v2107_v40 = vld [vmem:[#allocation5 + $0xc] ss:$16 sps:$4 sm:$0xff]   ;;  %v2112_v41 = vld [vmem:[#allocation5 + $0x8] ss:$16 sps:$4 sm:$0xff]   ;;  %v84_v56 = vsub.s32 3, %v71_v43  ;;  %s1504_s18 = sshll.u32 %s1957_s17, 4  ;;  %s1505_s18 = int_to_ptr.vmem [resolvable:$true] %s1504_s18 }
  0x34   :  { %v77_v50 = vrot.slane %v68_v45, %v76_v46  ;;  %v81_v58 = vrot.slane %v68_v45, %v80_v53  ;;  %s1921_s19 = scalar_lea.vmem %s1505_s18, 32  ;;  %p1926_p2 = scmp.lt.s32.totalorder %s1505_s18, %s1505_s18 }
  0x35   :  { %1522 = vmatmul.mubr.msk.bf16.vlgmr.msra.gmra.mxu1 %vm105_vm1, %v1649_v6  ;;  %407 = vmatpush1.bf16.msra.mxu0 %v2038_v19  ;;  %v85_v60 = vrot.slane %v68_v45, %v84_v56  ;;  %p1922_p1 = scmp.ne.s32.totalorder %s1505_s18, %s1921_s19  ;;  %p1927_p3 = scmp.lt.s32.totalorder %s1921_s19, %s1921_s19 }
  0x36   :  { %442 = vmatpush1.bf16.msra.mxu1 %v2035_v18  ;;  %408 = vmatprep.subr.bf16.mxu0 %v2043_v21 }
  0x37   :  { %443 = vmatprep.subr.bf16.mxu1 %v2041_v20  ;;  %473 = vmatprep.mubr.bf16.mxu1 %v1954_v0  ;;  %p1928_p4 = por %p1927_p3, %p1926_p2 }
  0x39   :  { %409 = vmatpush1.bf16.msra.mxu0 %v2048_v23  ;;  %p1929_p5 = pnand %p1928_p4, %p1922_p1 }
  0x3a   :  { %444 = vmatpush1.bf16.msra.mxu1 %v2046_v22  ;;  %410 = vmatprep.subr.bf16.mxu0 %v2056_v25 }
  0x3b   :  { %445 = vmatprep.subr.bf16.mxu1 %v2052_v24 }
  0x3d   :  { %411 = vmatpush1.bf16.msra.mxu0 %v2063_v27 }
  0x3e   :  { %446 = vmatpush1.bf16.msra.mxu1 %v2059_v26  ;;  %412 = vmatprep.subr.bf16.mxu0 %v2069_v29 }
  0x3f   :  { %447 = vmatprep.subr.bf16.mxu1 %v2067_v28 }
  0x41   :  { %413 = vmatpush1.bf16.msra.mxu0 %v2075_v31 }
  0x42   :  { %448 = vmatpush1.bf16.msra.mxu1 %v2073_v30  ;;  %414 = vmatprep.subr.bf16.mxu0 %v2081_v33 }
  0x43   :  { %449 = vmatprep.subr.bf16.mxu1 %v2079_v32 }
  0x45   :  { %415 = vmatpush1.bf16.msra.mxu0 %v2087_v35 }
  0x46   :  { %450 = vmatpush1.bf16.msra.mxu1 %v2085_v34  ;;  %511 = vmatprep.subr.bf16.mxu0 %v2004_v3 }
  0x47   :  { %451 = vmatprep.subr.bf16.mxu1 %v2091_v36 }
  0x48   :  { %433 = vmatmul.mubr.bf16.vlgmr.msra.gmra.mxu0 %v1954_v0 }
  0x49   :  { %512 = vmatpush1.bf16.msra.mxu0 %v2006_v5  ;;  %543 = vmatprep.mubr.bf16.mxu0 %v1954_v0 }
  0x4a   :  { %452 = vmatpush1.bf16.msra.mxu1 %v2095_v37  ;;  %513 = vmatprep.subr.bf16.mxu0 %v2014_v8 }
  0x4b   :  { %453 = vmatprep.subr.bf16.mxu1 %v2098_v38 }
  0x4d   :  { %514 = vmatpush1.bf16.msra.mxu0 %v2016_v9 }
  0x4e   :  { %454 = vmatpush1.bf16.msra.mxu1 %v2103_v39  ;;  %515 = vmatprep.subr.bf16.mxu0 %v2020_v13 }
  0x4f   :  { %455 = vmatprep.subr.bf16.mxu1 %v2107_v40 }
  0x51   :  { %516 = vmatpush1.bf16.msra.mxu0 %v2028_v16 }
  0x52   :  { %456 = vmatpush1.bf16.msra.mxu1 %v2112_v41  ;;  %517 = vmatprep.subr.bf16.mxu0 %v2032_v17 }
  0x53   :  { %552 = vmatprep.subr.bf16.mxu1 %v2022_v14 }
  0x55   :  { %474 = vmatmul.mubr.bf16.vlgmr.msra.gmra.mxu1 %v1954_v0  ;;  %518 = vmatpush1.bf16.msra.mxu0 %v2038_v19 }
  0x56   :  { %553 = vmatpush1.bf16.msra.mxu1 %v2035_v18  ;;  %519 = vmatprep.subr.bf16.mxu0 %v2043_v21 }
  0x57   :  { %554 = vmatprep.subr.bf16.mxu1 %v2041_v20  ;;  %584 = vmatprep.mubr.bf16.mxu1 %v1954_v0 }
  0x59   :  { %520 = vmatpush1.bf16.msra.mxu0 %v2048_v23 }
  0x5a   :  { %555 = vmatpush1.bf16.msra.mxu1 %v2046_v22  ;;  %521 = vmatprep.subr.bf16.mxu0 %v2056_v25 }
  0x5b   :  { %556 = vmatprep.subr.bf16.mxu1 %v2052_v24 }
  0x5d   :  { %522 = vmatpush1.bf16.msra.mxu0 %v2063_v27 }
  0x5e   :  { %557 = vmatpush1.bf16.msra.mxu1 %v2059_v26  ;;  %523 = vmatprep.subr.bf16.mxu0 %v2069_v29 }
  0x5f   :  { %558 = vmatprep.subr.bf16.mxu1 %v2067_v28 }
  0x61   :  { %524 = vmatpush1.bf16.msra.mxu0 %v2075_v31 }
  0x62   :  { %559 = vmatpush1.bf16.msra.mxu1 %v2073_v30  ;;  %525 = vmatprep.subr.bf16.mxu0 %v2081_v33 }
  0x63   :  { %560 = vmatprep.subr.bf16.mxu1 %v2079_v32 }
  0x65   :  { %526 = vmatpush1.bf16.msra.mxu0 %v2087_v35 }
  0x66   :  { %561 = vmatpush1.bf16.msra.mxu1 %v2085_v34  ;;  %640 = vmatprep.subr.bf16.mxu0 %v2004_v3 }
  0x67   :  { %562 = vmatprep.subr.bf16.mxu1 %v2091_v36 }
  0x6a   :  { %563 = vmatpush1.bf16.msra.mxu1 %v2095_v37 }
  0x6b   :  { %564 = vmatprep.subr.bf16.mxu1 %v2098_v38 }
  0x6e   :  { %565 = vmatpush1.bf16.msra.mxu1 %v2103_v39 }
  0x6f   :  { %566 = vmatprep.subr.bf16.mxu1 %v2107_v40 }
  0x72   :  { %567 = vmatpush1.bf16.msra.mxu1 %v2112_v41 }
  0x73   :  { %681 = vmatprep.subr.bf16.mxu1 %v2022_v14 }
  0xed   :  { %v156_v47 = vpop.f32.mrf.mxu1 }
  0xee   :  { %v2160_v2 = vadd.f32 %v156_v47, %v73_v48 }
  0xef   :  { %v158_v49 = vpop.f32.mrf.mxu1 }
  0xf0   :  { %v2162_v6 = vadd.f32 %v158_v49, %v77_v50 }
  0xf1   :  { %v160_v51 = vpop.f32.mrf.mxu1 }
  0xf2   :  { %v2152_v52 = vadd.f32 %v160_v51, %v73_v48 }
  0xf3   :  { %v162_v54 = vpop.f32.mrf.mxu1 }
  0xf4   :  { %v2154_v55 = vadd.f32 %v162_v54, %v77_v50 }
  0xf5   :  { %v199_v57 = vpop.f32.mrf.mxu1 }
  0xf6   :  { %v2169_v48 = vadd.f32 %v199_v57, %v81_v58 }
  0xf7   :  { %v201_v59 = vpop.f32.mrf.mxu1 }
  0xf8   :  { %v2166_v45 = vadd.f32 %v201_v59, %v85_v60 }
  0xf9   :  { %v203_v61 = vpop.f32.mrf.mxu1 }
  0xfa   :  { %v2156_v62 = vadd.f32 %v203_v61, %v81_v58 }
  0xfb   :  { %v205_v63 = vpop.f32.mrf.mxu1 }
  0xfc   :  { %v2158_v1 = vadd.f32 %v205_v63, %v85_v60 }
 0x108   :  { %v434_v4 = vpop.f32.mrf.mxu0 }
 0x109   :  { %v482_v7 = vadd.f32 %v434_v4, %v2160_v2 }
 0x10a   :  { %v436_v10 = vpop.f32.mrf.mxu0 }
 0x10b   :  { %v1555_v11 = vmul.f32 -1.442695, %v482_v7  ;;  %v483_v12 = vadd.f32 %v436_v10, %v2162_v6 }
 0x10c   :  { %v438_v15 = vpop.f32.mrf.mxu0 }
 0x10d   :  { %1697 = vpow2.f32 %v1555_v11  ;;  %v1556_v42 = vmul.f32 -1.442695, %v483_v12 }
 0x10e   :  { %v439_v43 = vpop.f32.mrf.mxu0 }
 0x10f   :  { %1699 = vpow2.f32 %v1556_v42 }
 0x115   :  { %v475_v44 = vpop.f32.mrf.mxu1 }
 0x116   :  { %v484_v53 = vadd.f32 %v475_v44, %v2169_v48 }
 0x117   :  { %v477_v46 = vpop.f32.mrf.mxu1 }
 0x118   :  { %v485_v47 = vadd.f32 %v477_v46, %v2166_v45 }
 0x119   :  { %v479_v49 = vpop.f32.mrf.mxu1 }
 0x11a   :  { %v1557_v50 = vmul.f32 -1.442695, %v485_v47  ;;  %v1698_v51 = vpop.eup %1697 }
 0x11b   :  { %v480_v54 = vpop.f32.mrf.mxu1  ;;  %v489_v56 = vadd.f32 1.0, %v1698_v51 }
 0x11c   :  { %v1700_v61 = vpop.eup %1699  ;;  %1701 = vpow2.f32 %v1557_v50 }
 0x11d   :  { %1703 = vrcp.f32 %v489_v56  ;;  %v495_v63 = vadd.f32 1.0, %v1700_v61 }
 0x11e   :  { %1705 = vtanh.f32 %v484_v53 }
 0x11f   :  { %1707 = vrcp.f32 %v495_v63 }
 0x129   :  { %v1702_v59 = vpop.eup %1701 }
 0x12a   :  { %v1704_v60 = vpop.eup %1703  ;;  %v502_v10 = vadd.f32 1.0, %v1702_v59 }
 0x12b   :  { %v1706_v4 = vpop.eup %1705 }
 0x12c   :  { %v1708_v7 = vpop.eup %1707  ;;  %v506_v58 = vmul.f32 %v1706_v4, %v1704_v60  ;;  %1709 = vrcp.f32 %v502_v10 }
 0x12d   :  { %v505_v57 = vmul.f32 0.0, %v1708_v7 }
 0x12f   :  { %v2172_v11 = vadd.f32 %v506_v58, %v505_v57 }
 0x131   :  { %1711 = vtanh.f32 %v2172_v11 }
 0x139   :  { %v1710_v12 = vpop.eup %1709 }
 0x13e   :  { %v1712_v15 = vpop.eup %1711 }
 0x13f   :  { %v509_v42 = vmul.f32 %v1712_v15, %v1710_v12 }
 0x141   :  { %v510_v43 = vpack.c.bf16 %v509_v42, %v509_v42 }
 0x143   :  { %544 = vmatmul.mubr.bf16.vlgmr.msra.gmra.mxu0 %v510_v43  ;;  %585 = vmatmul.mubr.bf16.vlgmr.msra.gmra.mxu1 %v510_v43 }
 0x144   :  { %641 = vmatpush1.bf16.msra.mxu0 %v2006_v5  ;;  %682 = vmatpush1.bf16.msra.mxu1 %v2035_v18 }
 0x145   :  { %642 = vmatprep.subr.bf16.mxu0 %v2014_v8  ;;  %683 = vmatprep.subr.bf16.mxu1 %v2041_v20 }
 0x146   :  { %672 = vmatprep.mubr.bf16.mxu0 %v1954_v0  ;;  %713 = vmatprep.mubr.bf16.mxu1 %v1954_v0 }
 0x148   :  { %643 = vmatpush1.bf16.msra.mxu0 %v2016_v9  ;;  %684 = vmatpush1.bf16.msra.mxu1 %v2046_v22 }
 0x149   :  { %644 = vmatprep.subr.bf16.mxu0 %v2020_v13  ;;  %685 = vmatprep.subr.bf16.mxu1 %v2052_v24 }
 0x14c   :  { %645 = vmatpush1.bf16.msra.mxu0 %v2028_v16  ;;  %686 = vmatpush1.bf16.msra.mxu1 %v2059_v26 }
 0x14d   :  { %646 = vmatprep.subr.bf16.mxu0 %v2032_v17  ;;  %687 = vmatprep.subr.bf16.mxu1 %v2067_v28 }
 0x150   :  { %647 = vmatpush1.bf16.msra.mxu0 %v2038_v19  ;;  %688 = vmatpush1.bf16.msra.mxu1 %v2073_v30 }
 0x151   :  { %648 = vmatprep.subr.bf16.mxu0 %v2043_v21  ;;  %689 = vmatprep.subr.bf16.mxu1 %v2079_v32 }
 0x154   :  { %649 = vmatpush1.bf16.msra.mxu0 %v2048_v23  ;;  %690 = vmatpush1.bf16.msra.mxu1 %v2085_v34 }
 0x155   :  { %650 = vmatprep.subr.bf16.mxu0 %v2056_v25  ;;  %691 = vmatprep.subr.bf16.mxu1 %v2091_v36 }
 0x158   :  { %651 = vmatpush1.bf16.msra.mxu0 %v2063_v27  ;;  %692 = vmatpush1.bf16.msra.mxu1 %v2095_v37 }
 0x159   :  { %652 = vmatprep.subr.bf16.mxu0 %v2069_v29  ;;  %693 = vmatprep.subr.bf16.mxu1 %v2098_v38 }
 0x15c   :  { %653 = vmatpush1.bf16.msra.mxu0 %v2075_v31  ;;  %694 = vmatpush1.bf16.msra.mxu1 %v2103_v39 }
 0x15d   :  { %654 = vmatprep.subr.bf16.mxu0 %v2081_v33  ;;  %695 = vmatprep.subr.bf16.mxu1 %v2107_v40 }
 0x160   :  { %655 = vmatpush1.bf16.msra.mxu0 %v2087_v35  ;;  %696 = vmatpush1.bf16.msra.mxu1 %v2112_v41 }
 0x161   :  { %769 = vmatprep.subr.bf16.mxu0 %v2004_v3  ;;  %810 = vmatprep.subr.bf16.mxu1 %v2022_v14 }
 0x203   :  { %v545_v44 = vpop.f32.mrf.mxu0  ;;  %v586_v46 = vpop.f32.mrf.mxu1 }
 0x204   :  { %v597_v47 = vrot.slane %v545_v44, 6  ;;  %v599_v57 = vrot.slane %v586_v46, 6 }
 0x205   :  { %v547_v49 = vpop.f32.mrf.mxu0  ;;  %v588_v50 = vpop.f32.mrf.mxu1 }
 0x206   :  { %v605_v51 = vadd.f32 %v597_v47, %v2160_v2  ;;  %v598_v53 = vrot.slane %v547_v49, 6  ;;  %v600_v7 = vrot.slane %v588_v50, 6  ;;  %v607_v15 = vadd.f32 %v599_v57, %v2169_v48 }
 0x207   :  { %v549_v54 = vpop.f32.mrf.mxu0  ;;  %v590_v56 = vpop.f32.mrf.mxu1 }
 0x208   :  { %v1558_v61 = vmul.f32 -1.442695, %v605_v51  ;;  %v606_v63 = vadd.f32 %v598_v53, %v2162_v6  ;;  %v608_v10 = vadd.f32 %v600_v7, %v2166_v45  ;;  %v629_v53 = vrot.slane %v2172_v11, 6 }
 0x209   :  { %v550_v59 = vpop.f32.mrf.mxu0  ;;  %v591_v60 = vpop.f32.mrf.mxu1 }
 0x20a   :  { %1713 = vpow2.f32 %v1558_v61  ;;  %v1559_v4 = vmul.f32 -1.442695, %v606_v63  ;;  %v1560_v58 = vmul.f32 -1.442695, %v608_v10 }
 0x20c   :  { %1715 = vpow2.f32 %v1559_v4 }
 0x20d   :  { %1717 = vpow2.f32 %v1560_v58 }
 0x217   :  { %v1714_v12 = vpop.eup %1713 }
 0x218   :  { %v612_v42 = vadd.f32 1.0, %v1714_v12 }
 0x219   :  { %v1716_v43 = vpop.eup %1715 }
 0x21a   :  { %1719 = vrcp.f32 %v612_v42  ;;  %v618_v44 = vadd.f32 1.0, %v1716_v43  ;;  %v1718_v47 = vpop.eup %1717 }
 0x21b   :  { %1721 = vtanh.f32 %v607_v15  ;;  %v625_v54 = vadd.f32 1.0, %v1718_v47 }
 0x21c   :  { %1723 = vrcp.f32 %v618_v44 }
 0x21d   :  { %1725 = vrcp.f32 %v625_v54 }
 0x227   :  { %v1720_v49 = vpop.eup %1719 }
 0x228   :  { %v1722_v51 = vpop.eup %1721 }
 0x229   :  { %v1724_v50 = vpop.eup %1723  ;;  %v632_v56 = vmul.f32 %v1722_v51, %v1720_v49 }
 0x22a   :  { %v631_v46 = vmul.f32 %v1724_v50, %v629_v53  ;;  %v1726_v63 = vpop.eup %1725 }
 0x22c   :  { %v2214_v61 = vadd.f32 %v632_v56, %v631_v46 }
 0x22e   :  { %1727 = vtanh.f32 %v2214_v61 }
 0x23b   :  { %v1728_v59 = vpop.eup %1727 }
 0x23c   :  { %v635_v60 = vmul.f32 %v1728_v59, %v1726_v63 }
 0x23e   :  { %v636_v4 = vpack.c.bf16 %v635_v60, %v635_v60 }
 0x240   :  { %v638_v7 = vrot.slane %v636_v4, 1 }
 0x242   :  { %673 = vmatmul.mubr.bf16.vlgmr.msra.gmra.mxu0 %v638_v7  ;;  %714 = vmatmul.mubr.bf16.vlgmr.msra.gmra.mxu1 %v638_v7 }
 0x243   :  { %770 = vmatpush1.bf16.msra.mxu0 %v2006_v5  ;;  %811 = vmatpush1.bf16.msra.mxu1 %v2035_v18 }
 0x244   :  { %771 = vmatprep.subr.bf16.mxu0 %v2014_v8  ;;  %812 = vmatprep.subr.bf16.mxu1 %v2041_v20 }
 0x245   :  { %801 = vmatprep.mubr.bf16.mxu0 %v1954_v0  ;;  %842 = vmatprep.mubr.bf16.mxu1 %v1954_v0 }
 0x247   :  { %772 = vmatpush1.bf16.msra.mxu0 %v2016_v9  ;;  %813 = vmatpush1.bf16.msra.mxu1 %v2046_v22 }
 0x248   :  { %773 = vmatprep.subr.bf16.mxu0 %v2020_v13  ;;  %814 = vmatprep.subr.bf16.mxu1 %v2052_v24 }
 0x24b   :  { %774 = vmatpush1.bf16.msra.mxu0 %v2028_v16  ;;  %815 = vmatpush1.bf16.msra.mxu1 %v2059_v26 }
 0x24c   :  { %775 = vmatprep.subr.bf16.mxu0 %v2032_v17  ;;  %816 = vmatprep.subr.bf16.mxu1 %v2067_v28 }
 0x24f   :  { %776 = vmatpush1.bf16.msra.mxu0 %v2038_v19  ;;  %817 = vmatpush1.bf16.msra.mxu1 %v2073_v30 }
 0x250   :  { %777 = vmatprep.subr.bf16.mxu0 %v2043_v21  ;;  %818 = vmatprep.subr.bf16.mxu1 %v2079_v32 }
 0x253   :  { %778 = vmatpush1.bf16.msra.mxu0 %v2048_v23  ;;  %819 = vmatpush1.bf16.msra.mxu1 %v2085_v34 }
 0x254   :  { %779 = vmatprep.subr.bf16.mxu0 %v2056_v25  ;;  %820 = vmatprep.subr.bf16.mxu1 %v2091_v36 }
 0x257   :  { %780 = vmatpush1.bf16.msra.mxu0 %v2063_v27  ;;  %821 = vmatpush1.bf16.msra.mxu1 %v2095_v37 }
 0x258   :  { %781 = vmatprep.subr.bf16.mxu0 %v2069_v29  ;;  %822 = vmatprep.subr.bf16.mxu1 %v2098_v38 }
 0x25b   :  { %782 = vmatpush1.bf16.msra.mxu0 %v2075_v31  ;;  %823 = vmatpush1.bf16.msra.mxu1 %v2103_v39 }
 0x25c   :  { %783 = vmatprep.subr.bf16.mxu0 %v2081_v33  ;;  %824 = vmatprep.subr.bf16.mxu1 %v2107_v40 }
 0x25f   :  { %784 = vmatpush1.bf16.msra.mxu0 %v2087_v35  ;;  %825 = vmatpush1.bf16.msra.mxu1 %v2112_v41 }
 0x260   :  { %898 = vmatprep.subr.bf16.mxu0 %v2004_v3  ;;  %939 = vmatprep.subr.bf16.mxu1 %v2022_v14 }
 0x302   :  { %v674_v11 = vpop.f32.mrf.mxu0  ;;  %v715_v10 = vpop.f32.mrf.mxu1 }
 0x303   :  { %v726_v57 = vrot.slane %v674_v11, 4  ;;  %v728_v46 = vrot.slane %v715_v10, 4 }
 0x304   :  { %v676_v58 = vpop.f32.mrf.mxu0  ;;  %v717_v12 = vpop.f32.mrf.mxu1 }
 0x305   :  { %v734_v15 = vadd.f32 %v726_v57, %v2160_v2  ;;  %v727_v42 = vrot.slane %v676_v58, 4  ;;  %v729_v54 = vrot.slane %v717_v12, 4  ;;  %v736_v60 = vadd.f32 %v728_v46, %v2169_v48 }
 0x306   :  { %v678_v43 = vpop.f32.mrf.mxu0  ;;  %v719_v44 = vpop.f32.mrf.mxu1 }
 0x307   :  { %v1561_v47 = vmul.f32 -1.442695, %v734_v15  ;;  %v735_v49 = vadd.f32 %v727_v42, %v2162_v6  ;;  %v737_v56 = vadd.f32 %v729_v54, %v2166_v45  ;;  %v758_v42 = vrot.slane %v2214_v61, 6 }
 0x308   :  { %v679_v51 = vpop.f32.mrf.mxu0  ;;  %v720_v53 = vpop.f32.mrf.mxu1 }
 0x309   :  { %1729 = vpow2.f32 %v1561_v47  ;;  %v1562_v50 = vmul.f32 -1.442695, %v735_v49  ;;  %v1563_v63 = vmul.f32 -1.442695, %v737_v56 }
 0x30b   :  { %1731 = vpow2.f32 %v1562_v50 }
 0x30c   :  { %1733 = vpow2.f32 %v1563_v63 }
 0x316   :  { %v1730_v59 = vpop.eup %1729 }
 0x317   :  { %v741_v4 = vadd.f32 1.0, %v1730_v59 }
 0x318   :  { %v1732_v7 = vpop.eup %1731 }
 0x319   :  { %1735 = vrcp.f32 %v741_v4  ;;  %v747_v11 = vadd.f32 1.0, %v1732_v7  ;;  %v1734_v57 = vpop.eup %1733 }
 0x31a   :  { %1737 = vtanh.f32 %v736_v60  ;;  %v754_v43 = vadd.f32 1.0, %v1734_v57 }
 0x31b   :  { %1739 = vrcp.f32 %v747_v11 }
 0x31c   :  { %1741 = vrcp.f32 %v754_v43 }
 0x326   :  { %v1736_v58 = vpop.eup %1735 }
 0x327   :  { %v1738_v15 = vpop.eup %1737 }
 0x328   :  { %v1740_v12 = vpop.eup %1739  ;;  %v761_v44 = vmul.f32 %v1738_v15, %v1736_v58 }
 0x329   :  { %v760_v10 = vmul.f32 %v1740_v12, %v758_v42  ;;  %v1742_v49 = vpop.eup %1741 }
 0x32b   :  { %v2256_v47 = vadd.f32 %v761_v44, %v760_v10 }
 0x32d   :  { %1743 = vtanh.f32 %v2256_v47 }
 0x33a   :  { %v1744_v51 = vpop.eup %1743 }
 0x33b   :  { %v764_v53 = vmul.f32 %v1744_v51, %v1742_v49 }
 0x33d   :  { %v765_v50 = vpack.c.bf16 %v764_v53, %v764_v53 }
 0x33f   :  { %v767_v54 = vrot.slane %v765_v50, 2 }
 0x341   :  { %802 = vmatmul.mubr.bf16.vlgmr.msra.gmra.mxu0 %v767_v54  ;;  %843 = vmatmul.mubr.bf16.vlgmr.msra.gmra.mxu1 %v767_v54 }
 0x342   :  { %899 = vmatpush1.bf16.msra.mxu0 %v2006_v5  ;;  %940 = vmatpush1.bf16.msra.mxu1 %v2035_v18 }
 0x343   :  { %900 = vmatprep.subr.bf16.mxu0 %v2014_v8  ;;  %941 = vmatprep.subr.bf16.mxu1 %v2041_v20 }
 0x344   :  { %930 = vmatprep.mubr.bf16.mxu0 %v1954_v0  ;;  %971 = vmatprep.mubr.bf16.mxu1 %v1954_v0 }
 0x346   :  { %901 = vmatpush1.bf16.msra.mxu0 %v2016_v9  ;;  %942 = vmatpush1.bf16.msra.mxu1 %v2046_v22 }
 0x347   :  { %902 = vmatprep.subr.bf16.mxu0 %v2020_v13  ;;  %943 = vmatprep.subr.bf16.mxu1 %v2052_v24 }
 0x34a   :  { %903 = vmatpush1.bf16.msra.mxu0 %v2028_v16  ;;  %944 = vmatpush1.bf16.msra.mxu1 %v2059_v26 }
 0x34b   :  { %904 = vmatprep.subr.bf16.mxu0 %v2032_v17  ;;  %945 = vmatprep.subr.bf16.mxu1 %v2067_v28 }
 0x34e   :  { %905 = vmatpush1.bf16.msra.mxu0 %v2038_v19  ;;  %946 = vmatpush1.bf16.msra.mxu1 %v2073_v30 }
 0x34f   :  { %906 = vmatprep.subr.bf16.mxu0 %v2043_v21  ;;  %947 = vmatprep.subr.bf16.mxu1 %v2079_v32 }
 0x352   :  { %907 = vmatpush1.bf16.msra.mxu0 %v2048_v23  ;;  %948 = vmatpush1.bf16.msra.mxu1 %v2085_v34 }
 0x353   :  { %908 = vmatprep.subr.bf16.mxu0 %v2056_v25  ;;  %949 = vmatprep.subr.bf16.mxu1 %v2091_v36 }
 0x356   :  { %909 = vmatpush1.bf16.msra.mxu0 %v2063_v27  ;;  %950 = vmatpush1.bf16.msra.mxu1 %v2095_v37 }
 0x357   :  { %910 = vmatprep.subr.bf16.mxu0 %v2069_v29  ;;  %951 = vmatprep.subr.bf16.mxu1 %v2098_v38 }
 0x35a   :  { %911 = vmatpush1.bf16.msra.mxu0 %v2075_v31  ;;  %952 = vmatpush1.bf16.msra.mxu1 %v2103_v39 }
 0x35b   :  { %912 = vmatprep.subr.bf16.mxu0 %v2081_v33  ;;  %953 = vmatprep.subr.bf16.mxu1 %v2107_v40 }
 0x35e   :  { %913 = vmatpush1.bf16.msra.mxu0 %v2087_v35  ;;  %954 = vmatpush1.bf16.msra.mxu1 %v2112_v41 }
 0x35f   :  { %1012 = vmatprep.subr.bf16.mxu0 %v2004_v3  ;;  %1053 = vmatprep.subr.bf16.mxu1 %v2022_v14 }
 0x401   :  { %v803_v61 = vpop.f32.mrf.mxu0  ;;  %v844_v56 = vpop.f32.mrf.mxu1 }
 0x402   :  { %v855_v46 = vrot.slane %v803_v61, 2  ;;  %v857_v10 = vrot.slane %v844_v56, 2 }
 0x403   :  { %v805_v63 = vpop.f32.mrf.mxu0  ;;  %v846_v59 = vpop.f32.mrf.mxu1 }
 0x404   :  { %v863_v60 = vadd.f32 %v855_v46, %v2160_v2  ;;  %v856_v4 = vrot.slane %v805_v63, 2  ;;  %v858_v43 = vrot.slane %v846_v59, 2  ;;  %v865_v53 = vadd.f32 %v857_v10, %v2169_v48 }
 0x405   :  { %v807_v7 = vpop.f32.mrf.mxu0  ;;  %v848_v11 = vpop.f32.mrf.mxu1  ;;  %v887_v63 = vrot.slane %v2256_v47, 6 }
 0x406   :  { %v1564_v57 = vmul.f32 -1.442695, %v863_v60  ;;  %v864_v58 = vadd.f32 %v856_v4, %v2162_v6  ;;  %v866_v44 = vadd.f32 %v858_v43, %v2166_v45 }
 0x407   :  { %v808_v15 = vpop.f32.mrf.mxu0  ;;  %v849_v42 = vpop.f32.mrf.mxu1 }
 0x408   :  { %1745 = vpow2.f32 %v1564_v57  ;;  %v1565_v12 = vmul.f32 -1.442695, %v864_v58  ;;  %v1566_v49 = vmul.f32 -1.442695, %v866_v44 }
 0x40a   :  { %1747 = vpow2.f32 %v1565_v12 }
 0x40b   :  { %1749 = vpow2.f32 %v1566_v49 }
 0x415   :  { %v1746_v51 = vpop.eup %1745 }
 0x416   :  { %v870_v2 = vadd.f32 1.0, %v1746_v51 }
 0x417   :  { %v1748_v50 = vpop.eup %1747 }
 0x418   :  { %1751 = vrcp.f32 %v870_v2  ;;  %v876_v54 = vadd.f32 1.0, %v1748_v50  ;;  %v1750_v6 = vpop.eup %1749 }
 0x419   :  { %1753 = vtanh.f32 %v865_v53  ;;  %v883_v60 = vadd.f32 1.0, %v1750_v6 }
 0x41a   :  { %1755 = vrcp.f32 %v876_v54 }
 0x41b   :  { %1757 = vrcp.f32 %v883_v60 }
 0x425   :  { %v1752_v61 = vpop.eup %1751 }
 0x426   :  { %v1754_v46 = vpop.eup %1753 }
 0x427   :  { %v1756_v59 = vpop.eup %1755  ;;  %v890_v45 = vmul.f32 %v1754_v46, %v1752_v61 }
 0x428   :  { %v889_v56 = vmul.f32 %v1756_v59, %v887_v63  ;;  %v1758_v48 = vpop.eup %1757 }
 0x42a   :  { %v2298_v4 = vadd.f32 %v890_v45, %v889_v56 }
 0x42c   :  { %1759 = vtanh.f32 %v2298_v4  ;;  %v1004_v46 = vrot.slane %v2298_v4, 6  ;;  %v2347_v4 = vld [vmem:[#allocation5 + $0xc4] ss:$16 sps:$4 sm:$0xff]  }
 0x439   :  { %v1760_v7 = vpop.eup %1759 }
 0x43a   :  { %v893_v11 = vmul.f32 %v1760_v7, %v1758_v48 }
 0x43c   :  { %v894_v57 = vpack.c.bf16 %v893_v11, %v893_v11 }
 0x43e   :  { %v896_v58 = vrot.slane %v894_v57, 3 }
 0x440   :  { %931 = vmatmul.mubr.bf16.vlgmr.msra.gmra.mxu0 %v896_v58  ;;  %972 = vmatmul.mubr.bf16.vlgmr.msra.gmra.mxu1 %v896_v58  ;;  %v2343_v58 = vld [vmem:[#allocation5 + $0xe0] ss:$16 sps:$4 sm:$0xff]  }
 0x441   :  { %1013 = vmatpush1.bf16.msra.mxu0 %v2006_v5  ;;  %1054 = vmatpush1.bf16.msra.mxu1 %v2035_v18 }
 0x442   :  { %1014 = vmatprep.subr.bf16.mxu0 %v2014_v8  ;;  %1055 = vmatprep.subr.bf16.mxu1 %v2041_v20 }
 0x443   :  { %1044 = vmatprep.mubr.bf16.mxu0 %v1954_v0  ;;  %1085 = vmatprep.mubr.bf16.mxu1 %v1954_v0 }
 0x445   :  { %1015 = vmatpush1.bf16.msra.mxu0 %v2016_v9  ;;  %1056 = vmatpush1.bf16.msra.mxu1 %v2046_v22 }
 0x446   :  { %1016 = vmatprep.subr.bf16.mxu0 %v2020_v13  ;;  %1057 = vmatprep.subr.bf16.mxu1 %v2052_v24 }
 0x449   :  { %1017 = vmatpush1.bf16.msra.mxu0 %v2028_v16  ;;  %1058 = vmatpush1.bf16.msra.mxu1 %v2059_v26 }
 0x44a   :  { %1018 = vmatprep.subr.bf16.mxu0 %v2032_v17  ;;  %1059 = vmatprep.subr.bf16.mxu1 %v2067_v28 }
 0x44d   :  { %1019 = vmatpush1.bf16.msra.mxu0 %v2038_v19  ;;  %1060 = vmatpush1.bf16.msra.mxu1 %v2073_v30 }
 0x44e   :  { %1020 = vmatprep.subr.bf16.mxu0 %v2043_v21  ;;  %1061 = vmatprep.subr.bf16.mxu1 %v2079_v32 }
 0x451   :  { %1021 = vmatpush1.bf16.msra.mxu0 %v2048_v23  ;;  %1062 = vmatpush1.bf16.msra.mxu1 %v2085_v34 }
 0x452   :  { %1022 = vmatprep.subr.bf16.mxu0 %v2056_v25  ;;  %1063 = vmatprep.subr.bf16.mxu1 %v2091_v36 }
 0x455   :  { %1023 = vmatpush1.bf16.msra.mxu0 %v2063_v27  ;;  %1064 = vmatpush1.bf16.msra.mxu1 %v2095_v37 }
 0x456   :  { %1024 = vmatprep.subr.bf16.mxu0 %v2069_v29  ;;  %1065 = vmatprep.subr.bf16.mxu1 %v2098_v38 }
 0x459   :  { %1025 = vmatpush1.bf16.msra.mxu0 %v2075_v31  ;;  %1066 = vmatpush1.bf16.msra.mxu1 %v2103_v39 }
 0x45a   :  { %1026 = vmatprep.subr.bf16.mxu0 %v2081_v33  ;;  %1067 = vmatprep.subr.bf16.mxu1 %v2107_v40 }
 0x45d   :  { %1027 = vmatpush1.bf16.msra.mxu0 %v2087_v35  ;;  %1068 = vmatpush1.bf16.msra.mxu1 %v2112_v41 }
 0x45e   :  { %1141 = vmatprep.subr.bf16.mxu0 %v2004_v3  ;;  %1182 = vmatprep.subr.bf16.mxu1 %v2022_v14 }
 0x500   :  { %v932_v5 = vpop.f32.mrf.mxu0  ;;  %v973_v8 = vpop.f32.mrf.mxu1 }
 0x501   :  { %v980_v9 = vadd.f32 %v932_v5, %v2152_v52  ;;  %v982_v51 = vadd.f32 %v973_v8, %v2156_v62  ;;  %v2353_v5 = vld [vmem:[#allocation5 + $0xc0] ss:$16 sps:$4 sm:$0xff]   ;;  %v2357_v8 = vld [vmem:[#allocation5 + $0xa4] ss:$16 sps:$4 sm:$0xff]  }
 0x502   :  { %v934_v13 = vpop.f32.mrf.mxu0  ;;  %v975_v16 = vpop.f32.mrf.mxu1 }
 0x503   :  { %v1567_v47 = vmul.f32 -1.442695, %v980_v9  ;;  %v981_v15 = vadd.f32 %v934_v13, %v2154_v55  ;;  %v983_v3 = vadd.f32 %v975_v16, %v2158_v1 }
 0x504   :  { %v936_v42 = vpop.f32.mrf.mxu0  ;;  %v977_v12 = vpop.f32.mrf.mxu1 }
 0x505   :  { %1761 = vpow2.f32 %v1567_v47  ;;  %v1568_v43 = vmul.f32 -1.442695, %v981_v15  ;;  %v1569_v49 = vmul.f32 -1.442695, %v983_v3 }
 0x506   :  { %v937_v44 = vpop.f32.mrf.mxu0  ;;  %v978_v10 = vpop.f32.mrf.mxu1 }
 0x507   :  { %1763 = vpow2.f32 %v1568_v43 }
 0x508   :  { %1765 = vpow2.f32 %v1569_v49 }
 0x512   :  { %v1762_v14 = vpop.eup %1761 }
 0x513   :  { %v987_v53 = vadd.f32 1.0, %v1762_v14 }
 0x514   :  { %v1764_v2 = vpop.eup %1763 }
 0x515   :  { %1767 = vrcp.f32 %v987_v53  ;;  %v993_v50 = vadd.f32 1.0, %v1764_v2  ;;  %v1766_v54 = vpop.eup %1765  ;;  %v1836_v2 = vld [vmem:[#allocation5 + $0xe8] ss:$16 sps:$4 sm:$0xff]  }
 0x516   :  { %1769 = vtanh.f32 %v982_v51  ;;  %v1000_v59 = vadd.f32 1.0, %v1766_v54  ;;  %v1838_v54 = vld [vmem:[#allocation5 + $0xc8] ss:$16 sps:$4 sm:$0xff]  }
 0x517   :  { %1771 = vrcp.f32 %v993_v50  ;;  %v1837_v50 = vld [vmem:[#allocation5 + $0xcc] ss:$16 sps:$4 sm:$0xff]  }
 0x518   :  { %1773 = vrcp.f32 %v1000_v59  ;;  %v1843_v59 = vld [vmem:[#allocation5 + $0x80] ss:$16 sps:$4 sm:$0xff]  }
 0x522   :  { %v1768_v6 = vpop.eup %1767 }
 0x523   :  { %v1770_v61 = vpop.eup %1769 }
 0x524   :  { %v1772_v63 = vpop.eup %1771  ;;  %v1007_v60 = vmul.f32 %v1770_v61, %v1768_v6  ;;  %v1839_v6 = vld [vmem:[#allocation5 + $0xac] ss:$16 sps:$4 sm:$0xff]   ;;  %v1840_v61 = vld [vmem:[#allocation5 + $0xa8] ss:$16 sps:$4 sm:$0xff]  }
 0x525   :  { %v1006_v45 = vmul.f32 %v1772_v63, %v1004_v46  ;;  %v1774_v48 = vpop.eup %1773  ;;  %v1841_v46 = vld [vmem:[#allocation5 + $0x84] ss:$16 sps:$4 sm:$0xff]   ;;  %v1842_v63 = vld [vmem:[#allocation5 + $0x8c] ss:$16 sps:$4 sm:$0xff]  }
 0x527   :  { %v2340_v56 = vadd.f32 %v1007_v60, %v1006_v45  ;;  %v1844_v60 = vld [vmem:[#allocation5 + $0x88] ss:$16 sps:$4 sm:$0xff]   ;;  %v1846_v45 = vld [vmem:[#allocation5 + $0x6c] ss:$16 sps:$4 sm:$0xff]  }
 0x529   :  { %1775 = vtanh.f32 %v2340_v56  ;;  %v1130_v15 = vrot.slane %v2340_v56, 6  ;;  %v1847_v56 = vld [vmem:[#allocation5 + $0x60] ss:$16 sps:$4 sm:$0xff]  }
 0x536   :  { %v1776_v7 = vpop.eup %1775 }
 0x537   :  { %v1010_v11 = vmul.f32 %v1776_v7, %v1774_v48  ;;  %v1848_v48 = vld [vmem:[#allocation5 + $0x68] ss:$16 sps:$4 sm:$0xff]   ;;  %v1849_v7 = vld [vmem:[#allocation5 + $0x44] ss:$16 sps:$4 sm:$0xff]  }
 0x539   :  { %v1011_v57 = vpack.c.bf16 %v1010_v11, %v1010_v11  ;;  %v1850_v11 = vld [vmem:[#allocation5 + $0x4c] ss:$16 sps:$4 sm:$0xff]  }
 0x53b   :  { %1045 = vmatmul.mubr.bf16.vlgmr.msra.gmra.mxu0 %v1011_v57  ;;  %1086 = vmatmul.mubr.bf16.vlgmr.msra.gmra.mxu1 %v1011_v57  ;;  %v1851_v57 = vld [vmem:[#allocation5 + $0x40] ss:$16 sps:$4 sm:$0xff]  }
 0x53c   :  { %1142 = vmatpush1.bf16.msra.mxu0 %v2343_v58  ;;  %1183 = vmatpush1.bf16.msra.mxu1 %v2035_v18  ;;  %v2361_v18 = vld [vmem:[#allocation5 + $0xa0] ss:$16 sps:$4 sm:$0xff]  }
 0x53d   :  { %1143 = vmatprep.subr.bf16.mxu0 %v2347_v4  ;;  %1184 = vmatprep.subr.bf16.mxu1 %v2041_v20 }
 0x53e   :  { %1173 = vmatprep.mubr.bf16.mxu0 %v1954_v0  ;;  %1214 = vmatprep.mubr.bf16.mxu1 %v1954_v0 }
 0x540   :  { %1144 = vmatpush1.bf16.msra.mxu0 %v2353_v5  ;;  %1185 = vmatpush1.bf16.msra.mxu1 %v2046_v22 }
 0x541   :  { %1145 = vmatprep.subr.bf16.mxu0 %v2357_v8  ;;  %1186 = vmatprep.subr.bf16.mxu1 %v2052_v24 }
 0x544   :  { %1146 = vmatpush1.bf16.msra.mxu0 %v2361_v18  ;;  %1187 = vmatpush1.bf16.msra.mxu1 %v2059_v26 }
 0x545   :  { %1147 = vmatprep.subr.bf16.mxu0 %v2032_v17  ;;  %1188 = vmatprep.subr.bf16.mxu1 %v2067_v28  ;;  %v1834_v17 = vld [vmem:[#allocation5 + $0xe4] ss:$16 sps:$4 sm:$0xff]  }
 0x548   :  { %1148 = vmatpush1.bf16.msra.mxu0 %v2038_v19  ;;  %1189 = vmatpush1.bf16.msra.mxu1 %v2073_v30  ;;  %v1835_v19 = vld [vmem:[#allocation5 + $0xec] ss:$16 sps:$4 sm:$0xff]  }
 0x549   :  { %1149 = vmatprep.subr.bf16.mxu0 %v2043_v21  ;;  %1190 = vmatprep.subr.bf16.mxu1 %v2079_v32 }
 0x54c   :  { %1150 = vmatpush1.bf16.msra.mxu0 %v2048_v23  ;;  %1191 = vmatpush1.bf16.msra.mxu1 %v2085_v34 }
 0x54d   :  { %1151 = vmatprep.subr.bf16.mxu0 %v2056_v25  ;;  %1192 = vmatprep.subr.bf16.mxu1 %v2091_v36 }
 0x550   :  { %1152 = vmatpush1.bf16.msra.mxu0 %v2063_v27  ;;  %1193 = vmatpush1.bf16.msra.mxu1 %v2095_v37 }
 0x551   :  { %1153 = vmatprep.subr.bf16.mxu0 %v2069_v29  ;;  %1194 = vmatprep.subr.bf16.mxu1 %v2098_v38 }
 0x554   :  { %1154 = vmatpush1.bf16.msra.mxu0 %v2075_v31  ;;  %1195 = vmatpush1.bf16.msra.mxu1 %v2103_v39 }
 0x555   :  { %1155 = vmatprep.subr.bf16.mxu0 %v2081_v33  ;;  %1196 = vmatprep.subr.bf16.mxu1 %v2107_v40 }
 0x558   :  { %1156 = vmatpush1.bf16.msra.mxu0 %v2087_v35  ;;  %1197 = vmatpush1.bf16.msra.mxu1 %v2112_v41 }
 0x559   :  { %1270 = vmatprep.subr.bf16.mxu0 %v1834_v17  ;;  %1311 = vmatprep.subr.bf16.mxu1 %v1835_v19  ;;  %v1857_v17 = vld [vmem:[#allocation5 + $0x4] ss:$16 sps:$4 sm:$0xff]   ;;  %v1858_v19 = vld [vmem:[#allocation5 + $0xc] ss:$16 sps:$4 sm:$0xff]  }
 0x5fb   :  { %v1046_v20 = vpop.f32.mrf.mxu0  ;;  %v1087_v21 = vpop.f32.mrf.mxu1 }
 0x5fc   :  { %v1098_v22 = vrot.slane %v1046_v20, 6  ;;  %v1100_v36 = vrot.slane %v1087_v21, 6  ;;  %v1859_v20 = vld [vmem:[#allocation5] ss:$16 sps:$4 sm:$0xff]   ;;  %v1860_v21 = vld [vmem:[#allocation5 + $0x8] ss:$16 sps:$4 sm:$0xff]  }
 0x5fd   :  { %v1048_v23 = vpop.f32.mrf.mxu0  ;;  %v1089_v24 = vpop.f32.mrf.mxu1 }
 0x5fe   :  { %v1106_v25 = vadd.f32 %v1098_v22, %v2152_v52  ;;  %v1099_v26 = vrot.slane %v1048_v23, 6  ;;  %v1101_v34 = vrot.slane %v1089_v24, 6  ;;  %v1108_v39 = vadd.f32 %v1100_v36, %v2156_v62 }
 0x5ff   :  { %v1050_v27 = vpop.f32.mrf.mxu0  ;;  %v1091_v28 = vpop.f32.mrf.mxu1 }
 0x600   :  { %v1570_v29 = vmul.f32 -1.442695, %v1106_v25  ;;  %v1107_v30 = vadd.f32 %v1099_v26, %v2154_v55  ;;  %v1109_v35 = vadd.f32 %v1101_v34, %v2158_v1 }
 0x601   :  { %v1051_v31 = vpop.f32.mrf.mxu0  ;;  %v1092_v32 = vpop.f32.mrf.mxu1 }
 0x602   :  { %1777 = vpow2.f32 %v1570_v29  ;;  %v1571_v33 = vmul.f32 -1.442695, %v1107_v30  ;;  %v1572_v37 = vmul.f32 -1.442695, %v1109_v35 }
 0x604   :  { %1779 = vpow2.f32 %v1571_v33 }
 0x605   :  { %1781 = vpow2.f32 %v1572_v37 }
 0x60f   :  { %v1778_v38 = vpop.eup %1777 }
 0x610   :  { %v1113_v40 = vadd.f32 1.0, %v1778_v38 }
 0x611   :  { %v1780_v41 = vpop.eup %1779 }
 0x612   :  { %1783 = vrcp.f32 %v1113_v40  ;;  %v1119_v9 = vadd.f32 1.0, %v1780_v41  ;;  %v1782_v13 = vpop.eup %1781 }
 0x613   :  { %1785 = vtanh.f32 %v1108_v39  ;;  %v1126_v12 = vadd.f32 1.0, %v1782_v13 }
 0x614   :  { %1787 = vrcp.f32 %v1119_v9 }
 0x615   :  { %1789 = vrcp.f32 %v1126_v12 }
 0x61f   :  { %v1784_v16 = vpop.eup %1783 }
 0x620   :  { %v1786_v47 = vpop.eup %1785 }
 0x621   :  { %v1788_v42 = vpop.eup %1787  ;;  %v1133_v43 = vmul.f32 %v1786_v47, %v1784_v16 }
 0x622   :  { %v1132_v44 = vmul.f32 %v1788_v42, %v1130_v15  ;;  %v1790_v3 = vpop.eup %1789 }
 0x624   :  { %v2390_v10 = vadd.f32 %v1133_v43, %v1132_v44 }
 0x626   :  { %1791 = vtanh.f32 %v2390_v10  ;;  %v1259_v12 = vrot.slane %v2390_v10, 6  ;;  %v1409_v10 = vld [vmem:[#allocation7 + $0x70] sm:$0xff] }
 0x633   :  { %v1792_v49 = vpop.eup %1791 }
 0x634   :  { %v1136_v14 = vmul.f32 %v1792_v49, %v1790_v3 }
 0x636   :  { %v1137_v51 = vpack.c.bf16 %v1136_v14, %v1136_v14 }
 0x638   :  { %v1139_v53 = vrot.slane %v1137_v51, 1 }
 0x63a   :  { %1174 = vmatmul.mubr.bf16.vlgmr.msra.gmra.mxu0 %v1139_v53  ;;  %1215 = vmatmul.mubr.bf16.vlgmr.msra.gmra.mxu1 %v1139_v53 }
 0x63b   :  { %1271 = vmatpush1.bf16.msra.mxu0 %v2343_v58  ;;  %1312 = vmatpush1.bf16.msra.mxu1 %v1836_v2  ;;  %v1852_v58 = vld [vmem:[#allocation5 + $0x48] ss:$16 sps:$4 sm:$0xff]  }
 0x63c   :  { %1272 = vmatprep.subr.bf16.mxu0 %v2347_v4  ;;  %1313 = vmatprep.subr.bf16.mxu1 %v1837_v50  ;;  %v1853_v4 = vld [vmem:[#allocation5 + $0x24] ss:$16 sps:$4 sm:$0xff]  }
 0x63d   :  { %1302 = vmatprep.mubr.bf16.mxu0 %v1954_v0  ;;  %1343 = vmatprep.mubr.bf16.mxu1 %v1954_v0  ;;  %v1845_v0 = vld [vmem:[#allocation5 + $0x64] ss:$16 sps:$4 sm:$0xff]  }
 0x63f   :  { %1273 = vmatpush1.bf16.msra.mxu0 %v2353_v5  ;;  %1314 = vmatpush1.bf16.msra.mxu1 %v1838_v54  ;;  %v1854_v5 = vld [vmem:[#allocation5 + $0x2c] ss:$16 sps:$4 sm:$0xff]  }
 0x640   :  { %1274 = vmatprep.subr.bf16.mxu0 %v2357_v8  ;;  %1315 = vmatprep.subr.bf16.mxu1 %v1839_v6  ;;  %v1855_v8 = vld [vmem:[#allocation5 + $0x20] ss:$16 sps:$4 sm:$0xff]   ;;  %v1955_v6 = vmov 0.0  }
 0x643   :  { %1275 = vmatpush1.bf16.msra.mxu0 %v2361_v18  ;;  %1316 = vmatpush1.bf16.msra.mxu1 %v1840_v61  ;;  %v1856_v18 = vld [vmem:[#allocation5 + $0x28] ss:$16 sps:$4 sm:$0xff]  }
 0x644   :  { %1276 = vmatprep.subr.bf16.mxu0 %v1841_v46  ;;  %1317 = vmatprep.subr.bf16.mxu1 %v1842_v63  ;;  %v1410_v61 = vld [vmem:[#allocation7 + $0x78] sm:$0xff]  ;;  %v1408_v46 = vld [vmem:[#allocation7 + $0x68] sm:$0xff]  ;;  %v1407_v63 = vld [vmem:[#allocation7 + $0x60] sm:$0xff] }
 0x647   :  { %1277 = vmatpush1.bf16.msra.mxu0 %v1843_v59  ;;  %1318 = vmatpush1.bf16.msra.mxu1 %v1844_v60  ;;  %v1406_v59 = vld [vmem:[#allocation7 + $0x58] sm:$0xff]  ;;  %v1405_v60 = vld [vmem:[#allocation7 + $0x50] sm:$0xff] }
 0x648   :  { %1278 = vmatprep.subr.bf16.mxu0 %v1845_v0  ;;  %1319 = vmatprep.subr.bf16.mxu1 %v1846_v45  ;;  %v1404_v0 = vld [vmem:[#allocation7 + $0x48] sm:$0xff]  ;;  %v1403_v45 = vld [vmem:[#allocation7 + $0x40] sm:$0xff] }
 0x64b   :  { %1279 = vmatpush1.bf16.msra.mxu0 %v1847_v56  ;;  %1320 = vmatpush1.bf16.msra.mxu1 %v1848_v48  ;;  %v1402_v56 = vld [vmem:[#allocation7 + $0x38] sm:$0xff]  ;;  %v1401_v48 = vld [vmem:[#allocation7 + $0x30] sm:$0xff] }
 0x64c   :  { %1280 = vmatprep.subr.bf16.mxu0 %v1849_v7  ;;  %1321 = vmatprep.subr.bf16.mxu1 %v1850_v11  ;;  %v1400_v7 = vld [vmem:[#allocation7 + $0x28] sm:$0xff]  ;;  %v1399_v11 = vld [vmem:[#allocation7 + $0x20] sm:$0xff] }
 0x64f   :  { %1281 = vmatpush1.bf16.msra.mxu0 %v1851_v57  ;;  %1322 = vmatpush1.bf16.msra.mxu1 %v1852_v58  ;;  %v1398_v57 = vld [vmem:[#allocation7 + $0x18] sm:$0xff]  ;;  %v1397_v58 = vld [vmem:[#allocation7 + $0x10] sm:$0xff] }
 0x650   :  { %1282 = vmatprep.subr.bf16.mxu0 %v1853_v4  ;;  %1323 = vmatprep.subr.bf16.mxu1 %v1854_v5  ;;  %v1396_v4 = vld [vmem:[#allocation7 + $0x8] sm:$0xff]  ;;  %v1395_v5 = vld [vmem:[#allocation7] sm:$0xff] }
 0x653   :  { %1283 = vmatpush1.bf16.msra.mxu0 %v1855_v8  ;;  %1324 = vmatpush1.bf16.msra.mxu1 %v1856_v18 }
 0x654   :  { %1284 = vmatprep.subr.bf16.mxu0 %v1857_v17  ;;  %1325 = vmatprep.subr.bf16.mxu1 %v1858_v19 }
 0x657   :  { %1285 = vmatpush1.bf16.msra.mxu0 %v1859_v20  ;;  %1326 = vmatpush1.bf16.msra.mxu1 %v1860_v21 }
 0x658   :  { %1598 = vmatprep.subr.mxu0 %v1955_v6 }
 0x6fa   :  { %v1175_v22 = vpop.f32.mrf.mxu0  ;;  %v1216_v23 = vpop.f32.mrf.mxu1 }
 0x6fb   :  { %v1227_v24 = vrot.slane %v1175_v22, 4  ;;  %v1229_v38 = vrot.slane %v1216_v23, 4 }
 0x6fc   :  { %v1177_v25 = vpop.f32.mrf.mxu0  ;;  %v1218_v26 = vpop.f32.mrf.mxu1 }
 0x6fd   :  { %v1235_v27 = vadd.f32 %v1227_v24, %v2152_v52  ;;  %v1228_v28 = vrot.slane %v1177_v25, 4  ;;  %v1230_v36 = vrot.slane %v1218_v26, 4  ;;  %v1237_v41 = vadd.f32 %v1229_v38, %v2156_v62 }
 0x6fe   :  { %v1179_v29 = vpop.f32.mrf.mxu0  ;;  %v1220_v30 = vpop.f32.mrf.mxu1 }
 0x6ff   :  { %v1573_v31 = vmul.f32 -1.442695, %v1235_v27  ;;  %v1236_v32 = vadd.f32 %v1228_v28, %v2154_v55  ;;  %v1238_v37 = vadd.f32 %v1230_v36, %v2158_v1 }
 0x700   :  { %v1180_v33 = vpop.f32.mrf.mxu0  ;;  %v1221_v34 = vpop.f32.mrf.mxu1 }
 0x701   :  { %1793 = vpow2.f32 %v1573_v31  ;;  %v1574_v35 = vmul.f32 -1.442695, %v1236_v32  ;;  %v1575_v39 = vmul.f32 -1.442695, %v1238_v37 }
 0x703   :  { %1795 = vpow2.f32 %v1574_v35 }
 0x704   :  { %1797 = vpow2.f32 %v1575_v39 }
 0x70e   :  { %v1794_v40 = vpop.eup %1793 }
 0x70f   :  { %v1242_v9 = vadd.f32 1.0, %v1794_v40 }
 0x710   :  { %v1796_v13 = vpop.eup %1795 }
 0x711   :  { %1799 = vrcp.f32 %v1242_v9  ;;  %v1248_v16 = vadd.f32 1.0, %v1796_v13  ;;  %v1798_v47 = vpop.eup %1797 }
 0x712   :  { %1801 = vtanh.f32 %v1237_v41  ;;  %v1255_v44 = vadd.f32 1.0, %v1798_v47 }
 0x713   :  { %1803 = vrcp.f32 %v1248_v16 }
 0x714   :  { %1805 = vrcp.f32 %v1255_v44 }
 0x71e   :  { %v1800_v15 = vpop.eup %1799 }
 0x71f   :  { %v1802_v42 = vpop.eup %1801 }
 0x720   :  { %v1804_v43 = vpop.eup %1803  ;;  %v1262_v3 = vmul.f32 %v1802_v42, %v1800_v15 }
 0x721   :  { %v1261_v49 = vmul.f32 %v1804_v43, %v1259_v12  ;;  %v1806_v51 = vpop.eup %1805  ;;  %v1579_v12 = vld [vmem:[%s2424_s5] ss:$0 sm:$0xff] }
 0x723   :  { %v2405_v14 = vadd.f32 %v1262_v3, %v1261_v49 }
 0x725   :  { %1807 = vtanh.f32 %v2405_v14  ;;  %v1388_v40 = vrot.slane %v2405_v14, 6 }
 0x732   :  { %v1808_v53 = vpop.eup %1807 }
 0x733   :  { %v1265_v2 = vmul.f32 %v1808_v53, %v1806_v51 }
 0x735   :  { %v1266_v50 = vpack.c.bf16 %v1265_v2, %v1265_v2 }
 0x737   :  { %v1268_v54 = vrot.slane %v1266_v50, 2 }
 0x739   :  { %1303 = vmatmul.mubr.bf16.vlgmr.msra.gmra.mxu0 %v1268_v54  ;;  %1344 = vmatmul.mubr.bf16.vlgmr.msra.gmra.mxu1 %v1268_v54 }
 0x73a   :  { %1599 = vmatpush3.msra.mxu0 %v1410_v61  ;;  %1630 = vmatprep.mubr.msk.f32.mxu0 %vm1956_vm2, %v1955_v6 }
 0x73b   :  { %1600 = vmatprep.subr.mxu0 %v1955_v6 }
 0x73c   :  { %1601 = vmatpush3.msra.mxu0 %v1409_v10 }
 0x73d   :  { %1602 = vmatprep.subr.mxu0 %v1955_v6 }
 0x73e   :  { %1603 = vmatpush3.msra.mxu0 %v1408_v46 }
 0x73f   :  { %1604 = vmatprep.subr.mxu0 %v1955_v6 }
 0x740   :  { %1605 = vmatpush3.msra.mxu0 %v1407_v63 }
 0x741   :  { %1606 = vmatprep.subr.mxu0 %v1955_v6 }
 0x742   :  { %1607 = vmatpush3.msra.mxu0 %v1406_v59 }
 0x743   :  { %1608 = vmatprep.subr.mxu0 %v1955_v6 }
 0x744   :  { %1609 = vmatpush3.msra.mxu0 %v1405_v60 }
 0x745   :  { %1610 = vmatprep.subr.mxu0 %v1955_v6 }
 0x746   :  { %1611 = vmatpush3.msra.mxu0 %v1404_v0 }
 0x747   :  { %1612 = vmatprep.subr.mxu0 %v1955_v6 }
 0x748   :  { %1613 = vmatpush3.msra.mxu0 %v1403_v45 }
 0x749   :  { %1614 = vmatprep.subr.mxu0 %v1955_v6 }
 0x74a   :  { %1615 = vmatpush3.msra.mxu0 %v1402_v56 }
 0x74b   :  { %1616 = vmatprep.subr.mxu0 %v1955_v6 }
 0x74c   :  { %1617 = vmatpush3.msra.mxu0 %v1401_v48 }
 0x74d   :  { %1618 = vmatprep.subr.mxu0 %v1955_v6 }
 0x74e   :  { %1619 = vmatpush3.msra.mxu0 %v1400_v7 }
 0x74f   :  { %1620 = vmatprep.subr.mxu0 %v1955_v6 }
 0x750   :  { %1621 = vmatpush3.msra.mxu0 %v1399_v11 }
 0x751   :  { %1622 = vmatprep.subr.mxu0 %v1955_v6 }
 0x752   :  { %1623 = vmatpush3.msra.mxu0 %v1398_v57 }
 0x753   :  { %1624 = vmatprep.subr.mxu0 %v1955_v6 }
 0x754   :  { %1625 = vmatpush3.msra.mxu0 %v1397_v58 }
 0x755   :  { %1626 = vmatprep.subr.mxu0 %v1955_v6 }
 0x756   :  { %1627 = vmatpush3.msra.mxu0 %v1396_v4 }
 0x757   :  { %1628 = vmatprep.subr.mxu0 %v1955_v6 }
 0x758   :  { %1629 = vmatpush3.msra.mxu0 %v1395_v5 }
 0x7f9   :  { %v1304_v8 = vpop.f32.mrf.mxu0  ;;  %v1345_v18 = vpop.f32.mrf.mxu1 }
 0x7fa   :  { %v1356_v17 = vrot.slane %v1304_v8, 2  ;;  %v1358_v32 = vrot.slane %v1345_v18, 2 }
 0x7fb   :  { %v1306_v19 = vpop.f32.mrf.mxu0  ;;  %v1347_v20 = vpop.f32.mrf.mxu1 }
 0x7fc   :  { %v1364_v21 = vadd.f32 %v1356_v17, %v2152_v52  ;;  %v1357_v22 = vrot.slane %v1306_v19, 2  ;;  %v1359_v30 = vrot.slane %v1347_v20, 2  ;;  %v1366_v35 = vadd.f32 %v1358_v32, %v2156_v62 }
 0x7fd   :  { %v1308_v23 = vpop.f32.mrf.mxu0  ;;  %v1349_v24 = vpop.f32.mrf.mxu1 }
 0x7fe   :  { %v1576_v25 = vmul.f32 -1.442695, %v1364_v21  ;;  %v1365_v26 = vadd.f32 %v1357_v22, %v2154_v55  ;;  %v1367_v31 = vadd.f32 %v1359_v30, %v2158_v1 }
 0x7ff   :  { %v1309_v27 = vpop.f32.mrf.mxu0  ;;  %v1350_v28 = vpop.f32.mrf.mxu1 }
 0x800   :  { %1809 = vpow2.f32 %v1576_v25  ;;  %v1577_v29 = vmul.f32 -1.442695, %v1365_v26  ;;  %v1578_v33 = vmul.f32 -1.442695, %v1367_v31 }
 0x802   :  { %1811 = vpow2.f32 %v1577_v29 }
 0x803   :  { %1813 = vpow2.f32 %v1578_v33 }
 0x80d   :  { %v1810_v34 = vpop.eup %1809 }
 0x80e   :  { %v1371_v52 = vadd.f32 1.0, %v1810_v34 }
 0x80f   :  { %v1812_v36 = vpop.eup %1811 }
 0x810   :  { %1815 = vrcp.f32 %v1371_v52  ;;  %v1377_v37 = vadd.f32 1.0, %v1812_v36  ;;  %v1814_v55 = vpop.eup %1813 }
 0x811   :  { %1817 = vtanh.f32 %v1366_v35  ;;  %v1384_v9 = vadd.f32 1.0, %v1814_v55 }
 0x812   :  { %1819 = vrcp.f32 %v1377_v37 }
 0x813   :  { %1821 = vrcp.f32 %v1384_v9 }
 0x81d   :  { %v1816_v38 = vpop.eup %1815 }
 0x81e   :  { %v1818_v39 = vpop.eup %1817 }
 0x81f   :  { %v1820_v41 = vpop.eup %1819  ;;  %v1391_v1 = vmul.f32 %v1818_v39, %v1816_v38 }
 0x820   :  { %v1390_v13 = vmul.f32 %v1820_v41, %v1388_v40  ;;  %v1822_v62 = vpop.eup %1821 }
 0x822   :  { %v1392_v16 = vadd.f32 %v1391_v1, %v1390_v13 }
 0x824   :  { %1823 = vtanh.f32 %v1392_v16 }
 0x831   :  { %v1824_v47 = vpop.eup %1823 }
 0x832   :  { %v1394_v15 = vmul.f32 %v1824_v47, %v1822_v62 }
 0x834   :  { %v1419_v42 = vrot.slane %v1394_v15, 6 }
 0x836   :  { %1631 = vmatmul.mubr.f32.vlgmr.msra.gmra.mxu0 %v1419_v42 }
 0x8f6   :  { %v1487_v43 = vpop.f32.mrf.mxu0 }
 0x8f7   :  { %v1488_v44 = vadd.f32 %v1579_v12, %v1487_v43 }
 0x8f8   :  { %v1632_v3 = vpop.f32.mrf.mxu0 }
 0x8f9   :  { %v1580_v49 = vmul.f32 -1.442695, %v1488_v44 }
 0x8fb   :  { %1825 = vpow2.f32 %v1580_v49 }
 0x908   :  { %v1826_v14 = vpop.eup %1825 }
 0x909   :  { %v1494_v51 = vadd.f32 1.0, %v1826_v14 }
 0x90b   :  { %1827 = vrcp.f32 %v1494_v51 }
 0x918   :  { %v1828_v53 = vpop.eup %1827 }
 0x919   :  { %1497 = vst [vmem:[#allocation8] sm:$0x3] %v1828_v53 }
 0x91a   :  { %1932 = shalt.err (!%p1929_p5)
}
 0x91b   :  { %1507 = dma.vmem_to_hbm [thread:$0]  %s1505_s18, 32, %s2425_s6, [#allocation4]  }
 0x91c   :  { %1945 = dma.done.wait [#allocation4], 32  }
 0x91d   :  { %1946 = vsyncadd [#allocation4], 4294967264 }
 0x91e   :  { %1511 = vsyncpa [#allocation3], 1 }
 0x91f   :  { %1512 = vsyncpa [#allocation6], 1 }
 0x920   :  { %1513 = vsyncpa [#allocation4], 1 }

</bundles_post_ra>
